<compile_context>
chip_gen: v7x
topology: tpu7x:2x2x1
jax: 0.10.0
libtpu: 0.0.40
codegen_flags: <defaults>
</compile_context>

<pallas_src>
import functools
import math

import jax
import jax.numpy as jnp
from jax.experimental import pallas as pl
from jax.experimental.pallas import tpu as pltpu


# ------------------------------------------------------------------
# Fused embedding gather kernel (vectorized, lane-dense output)
# ------------------------------------------------------------------
_TOKEN_BLOCK = 512                 # tokens per grid step (review: 256-512, was 8)
_TOKEN_HALF = _TOKEN_BLOCK // 2    # packed output rows per grid step
_VOCAB_PAD = 128                   # fused z(100)+solv(4) vocab padded to one lane tile
_EMB_D = 64                        # 2 embeddings of width 64 pack one 128-lane row
_LANES = 128


def _bf16_planes(x):
    """Split f32 x into 3 bf16 planes with x ~= p0+p1+p2 (f32-accurate, '3-pass')."""
    p0 = x.astype(jnp.bfloat16)
    r1 = x - p0.astype(jnp.float32)
    p1 = r1.astype(jnp.bfloat16)
    r2 = r1 - p1.astype(jnp.float32)
    p2 = r2.astype(jnp.bfloat16)
    return (p0, p1, p2)


def _embed_gather_kernel(ids_ref, tbl_ref, out_ref):
    # ids_ref : (TOKEN_HALF, 2) int32  -- [even-token id, odd-token id] per output row
    # tbl_ref : (6, 128, 128) bf16     -- resident table planes:
    #                                     [even_hi, even_mid, even_lo, odd_hi, odd_mid, odd_lo]
    #                                     even planes live in lanes 0:64, odd in 64:128
    # out_ref : (TOKEN_HALF, 128) f32  -- lane-dense: two 64-wide embeddings per row
    ids = ids_ref[...]
    vocab = jax.lax.broadcasted_iota(jnp.int32, (_TOKEN_HALF, _VOCAB_PAD), 1)
    # Block-wide one-hot build on the VPU (no per-row scalar loop, no masked stores).
    oh_e = jnp.where(ids[:, 0:1] == vocab, 1.0, 0.0).astype(jnp.bfloat16)
    oh_o = jnp.where(ids[:, 1:2] == vocab, 1.0, 0.0).astype(jnp.bfloat16)
    # 0/1 one-hot x bf16 plane is exact; summing the 3 planes reconstructs the
    # original f32 embedding to ~1 ulp (review-approved exact "3-pass" gather).
    out_ref[...] = (jnp.dot(oh_e, tbl_ref[0], preferred_element_type=jnp.float32)
                    + jnp.dot(oh_o, tbl_ref[3], preferred_element_type=jnp.float32))
    for p in (1, 2):
        out_ref[...] += (jnp.dot(oh_e, tbl_ref[p], preferred_element_type=jnp.float32)
                         + jnp.dot(oh_o, tbl_ref[3 + p], preferred_element_type=jnp.float32))


def _pack_table_planes(table_f32):
    """(V, 64) f32 -> (6, 128, 128) bf16 plane stack used by the gather kernel."""
    V, D = table_f32.shape
    tbl = jnp.zeros((_VOCAB_PAD, D), jnp.float32).at[:V, :].set(table_f32)
    slabs = []
    for j in range(2):                              # even / odd lane half of the output row
        for p in _bf16_planes(tbl):
            slab = jnp.zeros((_VOCAB_PAD, 2 * D), jnp.bfloat16)
            slab = slab.at[:, j * D:(j + 1) * D].set(p)
            slabs.append(slab)
    return jnp.stack(slabs)                          # (6, 128, 128) bf16  (~192 KiB)


def embed_lookup(ids_flat, table):
    """Row gather: ids_flat [T] int -> table[ids] as [T, 64] float32 (f32-accurate)."""
    T = int(ids_flat.shape[0])
    V, D = int(table.shape[0]), int(table.shape[1])
    if D != _EMB_D:
        # TODO(synk): generalise the lane-packing to other embedding widths.
        raise NotImplementedError("embed_lookup is specialised to 64-wide embeddings")
    if V > _VOCAB_PAD:
        raise NotImplementedError("vocab larger than one padded tile not needed here")
    # Clamp so an out-of-range id can never address outside the table
    # (torch would raise; here we guard instead of silently returning garbage).
    ids = jnp.clip(ids_flat.reshape(-1).astype(jnp.int32), 0, V - 1)
    Tp = math.ceil(T / _TOKEN_BLOCK) * _TOKEN_BLOCK
    if Tp != T:
        ids = jnp.pad(ids, (0, Tp - T))              # pads only the tiny id vector
    ids2 = ids.reshape(Tp // 2, 2)                   # [even id, odd id] per output row
    tbl_planes = _pack_table_planes(table.astype(jnp.float32))

    grid = (Tp // _TOKEN_BLOCK,)
    out = pl.pallas_call(
        _embed_gather_kernel,
        out_shape=jax.ShapeDtypeStruct((Tp // 2, 2 * _EMB_D), jnp.float32),
        grid=grid,
        in_specs=[
            pl.BlockSpec((_TOKEN_HALF, 2), lambda i: (i, 0)),
            # Constant block index -> DMA'd to VMEM once, kept resident.
            # (pl.Buffered(1) would drop the unused 2nd pipeline buffer; negligible
            #  at 192 KiB so we keep the known-good constant-index_map form.)
            pl.BlockSpec((6, _VOCAB_PAD, 2 * _EMB_D), lambda i: (0, 0, 0)),
        ],
        # Lane-dense output block: full (256, 128) f32 tiles -> unmasked stores.
        out_specs=pl.BlockSpec((_TOKEN_HALF, 2 * _EMB_D), lambda i: (i, 0)),
        compiler_params=pltpu.CompilerParams(
            dimension_semantics=("parallel",)),      # big blocks -> v7x 2-TC split pays off
    )(ids2, tbl_planes)
    # (Tp/2, 128) row-major == (Tp, 64): free reshape back to one row per token.
    return out.reshape(Tp, _EMB_D)[:T]


# ------------------------------------------------------------------
# MSE loss kernel (ModelBase.loss): flatten + mean((pred - label)^2)
# ------------------------------------------------------------------
def _mse_kernel(p_ref, l_ref, out_ref, acc_ref, *, inv_n, n_rows):
    i = pl.program_id(0)

    @pl.when(i == 0)
    def _init():
        acc_ref[...] = jnp.zeros_like(acc_ref)

    d = p_ref[...] - l_ref[...]
    # Ragged tail handled in-kernel: rows of a partial last grid block read
    # unspecified padding, so mask them instead of padding the inputs in HBM.
    row = jax.lax.broadcasted_iota(jnp.int32, d.shape, 0) + i * d.shape[0]
    acc_ref[...] += jnp.where(row < n_rows, d * d, 0.0)

    @pl.when(i == pl.num_programs(0) - 1)
    def _finalize():
        # Single end-of-grid cross-lane reduce (XLU stays out of the hot loop).
        # NOTE: the (1,1) f32 output pads to one (8,128) VMEM tile; an SMEM
        # scalar output would avoid the masked single-element store (minor).
        out_ref[0, 0] = jnp.sum(acc_ref[...]) * inv_n


def mse_loss(pred, label, block_rows=1024):
    """Equivalent to F.mse_loss(pred.reshape(-1), label.reshape(-1))."""
    p = pred.reshape(-1).astype(jnp.float32)
    l = label.reshape(-1).astype(jnp.float32)
    n = int(p.shape[0])
    rem = n % _LANES
    if rem:  # only a <=127-element boundary pad (never pad to block multiples)
        p = jnp.pad(p, (0, _LANES - rem))
        l = jnp.pad(l, (0, _LANES - rem))
    rows = int(p.shape[0]) // _LANES
    P = p.reshape(rows, _LANES)
    L = l.reshape(rows, _LANES)

    if rows <= 8:
        br = rows                                   # single full block
    else:
        br = min(int(block_rows), (rows // 8) * 8)
        br = max(8, (br // 8) * 8)                  # multiple of 8 sublanes
    grid = (pl.cdiv(rows, br),)

    # TODO(synk): on v7x, split into a 2-way "parallel" leading axis with one
    #             partial accumulator per TensorCore and combine in the wrapper.
    out = pl.pallas_call(
        functools.partial(_mse_kernel, inv_n=1.0 / float(n), n_rows=rows),
        out_shape=jax.ShapeDtypeStruct((1, 1), jnp.float32),
        grid=grid,
        in_specs=[pl.BlockSpec((br, _LANES), lambda i: (i, 0)),
                  pl.BlockSpec((br, _LANES), lambda i: (i, 0))],
        out_specs=pl.BlockSpec((1, 1), lambda i: (0, 0)),
        scratch_shapes=[pltpu.VMEM((br, _LANES), jnp.float32)],
        compiler_params=pltpu.CompilerParams(
            dimension_semantics=("arbitrary",)),    # running accumulator -> sequential
    )(P, L)
    return out[0, 0]


# ------------------------------------------------------------------
# Parameter init (matches nn.Embedding defaults; padding_idx=0 row zeroed)
# ------------------------------------------------------------------
def init_params(key, n_filters=64):
    k1, k2 = jax.random.split(key)
    emb_z = jax.random.normal(k1, (100, n_filters), dtype=jnp.float32)
    emb_z = emb_z.at[0].set(0.0)                    # padding_idx=0
    emb_solv = jax.random.normal(k2, (4, 64), dtype=jnp.float32)
    return {"embedding_z": emb_z, "embedding_solv": emb_solv}


def schnet_avg_embeddings(params, z_ids, solv_ids):
    """Embedding stage of SchNetAvg.forward:
         x       = embedding_z(z.reshape(-1))   -> [B*N, n_filters]
         solvent = embedding_solv(solvent)      -> [B, 64]
       Both lookups are fused into ONE kernel launch by concatenating the two
       (same-width) tables and offsetting the solvent ids."""
    B, N = z_ids.shape
    emb_z, emb_s = params["embedding_z"], params["embedding_solv"]
    z_flat = jnp.clip(z_ids.reshape(-1).astype(jnp.int32), 0, emb_z.shape[0] - 1)
    s_flat = jnp.clip(solv_ids.reshape(-1).astype(jnp.int32), 0, emb_s.shape[0] - 1)
    table = jnp.concatenate([emb_z, emb_s], axis=0)                 # (100+4, 64)
    ids = jnp.concatenate([z_flat, s_flat + emb_z.shape[0]])
    both = embed_lookup(ids, table)
    x, solvent = both[:B * N], both[B * N:]
    return x.reshape(B, N, -1), solvent


if __name__ == "__main__":
    key = jax.random.PRNGKey(0)
    kp, kz, ks, kpred, klab, kp2, kl2 = jax.random.split(key, 7)

    n_filters = 64
    B, N = 2, 8
    params = init_params(kp, n_filters=n_filters)

    # atomic numbers in [0, 100), 0 = padding; solvent ids in [0, 4)
    z_ids = jax.random.randint(kz, (B, N), 0, 100, dtype=jnp.int32)
    z_ids = z_ids.at[:, -2:].set(0)                 # some padded positions
    solv_ids = jax.random.randint(ks, (B,), 0, 4, dtype=jnp.int32)

    z_emb, solv_emb = schnet_avg_embeddings(params, z_ids, solv_ids)
    jax.block_until_ready((z_emb, solv_emb))

    # reference check (3-plane reconstruction is exact to ~1 ulp of f32)
    z_ref = jnp.take(params["embedding_z"], z_ids.reshape(-1), axis=0).reshape(B, N, n_filters)
    s_ref = jnp.take(params["embedding_solv"], solv_ids, axis=0)
    assert jnp.allclose(z_emb, z_ref, rtol=1e-5, atol=1e-6), "z embedding mismatch"
    assert jnp.allclose(solv_emb, s_ref, rtol=1e-5, atol=1e-6), "solv embedding mismatch"

    # loss path (ModelBase.loss): the module's actual pred/label shape [B, 1]
    pred = jax.random.normal(kpred, (B, 1), dtype=jnp.float32)
    label = jax.random.normal(klab, (B, 1), dtype=jnp.float32)
    loss = mse_loss(pred, label)
    jax.block_until_ready(loss)
    loss_ref = jnp.mean((pred.reshape(-1) - label.reshape(-1)) ** 2)
    assert jnp.allclose(loss, loss_ref, rtol=1e-5, atol=1e-6), "mse loss mismatch"

    # gridded + ragged reduction path: 20480 elems = 160 rows, block_rows=64 ->
    # grid of 3 with a masked partial last block (no wrapper padding materialised).
    pred2 = jax.random.normal(kp2, (40, 8, 64), dtype=jnp.float32)
    label2 = jax.random.normal(kl2, (40, 8, 64), dtype=jnp.float32)
    loss2 = mse_loss(pred2, label2, block_rows=64)
    jax.block_until_ready(loss2)
    loss2_ref = jnp.mean((pred2.reshape(-1) - label2.reshape(-1)) ** 2)
    assert jnp.allclose(loss2, loss2_ref, rtol=1e-5, atol=1e-6), "chunked mse mismatch"

    print("KERNEL_OK")
</pallas_src>

<mosaic_0001>
module attributes {stable_mosaic.version = 11 : i64} {
  func.func @_embed_gather_kernel(%arg0: i32, %arg1: memref<256x2xi32, #tpu.memory_space<vmem>>, %arg2: memref<6x128x128xbf16, #tpu.memory_space<vmem>>, %arg3: memref<256x128xf32, #tpu.memory_space<vmem>>) attributes {dimension_semantics = [#tpu.dimension_semantics<parallel>], iteration_bounds = array<i64: 1>, scalar_prefetch = 0 : i64, scratch_operands = 0 : i64, tpu.core_type = #tpu.core_type<tc>, window_params = [{transform_indices = @transform_0, window_bounds = array<i64: 256, 2>}, {pipeline_mode = #tpu.pipeline_mode<synchronous>, transform_indices = @transform_1, window_bounds = array<i64: 6, 128, 128>}, {transform_indices = @transform_2, window_bounds = array<i64: 256, 128>}]} {
    %c0 = arith.constant 0 : index
    %c0_0 = arith.constant 0 : index
    %0 = vector.load %arg1[%c0, %c0_0] : memref<256x2xi32, #tpu.memory_space<vmem>>, vector<256x2xi32>
    %1 = tpu.iota {dimensions = array<i32: 1>} : vector<256x128xi32>
    %2 = vector.extract_strided_slice %0 {offsets = [0, 0], sizes = [256, 1], strides = [1, 1]} : vector<256x2xi32> to vector<256x1xi32>
    %3 = vector.broadcast %2 : vector<256x1xi32> to vector<256x128xi32>
    %4 = arith.cmpi eq, %3, %1 : vector<256x128xi32>
    %cst = arith.constant 1.000000e+00 : f32
    %cst_1 = arith.constant 0.000000e+00 : f32
    %5 = vector.broadcast %cst : f32 to vector<256x128xf32>
    %6 = vector.broadcast %cst_1 : f32 to vector<256x128xf32>
    %7 = arith.select %4, %5, %6 : vector<256x128xi1>, vector<256x128xf32>
    %8 = arith.truncf %7 : vector<256x128xf32> to vector<256x128xbf16>
    %9 = vector.extract_strided_slice %0 {offsets = [0, 1], sizes = [256, 1], strides = [1, 1]} : vector<256x2xi32> to vector<256x1xi32>
    %10 = vector.broadcast %9 : vector<256x1xi32> to vector<256x128xi32>
    %11 = arith.cmpi eq, %10, %1 : vector<256x128xi32>
    %cst_2 = arith.constant 1.000000e+00 : f32
    %cst_3 = arith.constant 0.000000e+00 : f32
    %12 = vector.broadcast %cst_2 : f32 to vector<256x128xf32>
    %13 = vector.broadcast %cst_3 : f32 to vector<256x128xf32>
    %14 = arith.select %11, %12, %13 : vector<256x128xi1>, vector<256x128xf32>
    %15 = arith.truncf %14 : vector<256x128xf32> to vector<256x128xbf16>
    %c0_4 = arith.constant 0 : index
    %c0_5 = arith.constant 0 : index
    %c0_6 = arith.constant 0 : index
    %16 = vector.load %arg2[%c0_4, %c0_5, %c0_6] : memref<6x128x128xbf16, #tpu.memory_space<vmem>>, vector<1x128x128xbf16>
    %17 = vector.shape_cast %16 : vector<1x128x128xbf16> to vector<128x128xbf16>
    %cst_7 = arith.constant dense<0.000000e+00> : vector<256x128xf32>
    %18 = tpu.matmul %8, %17, %cst_7 {dimension_numbers = #tpu.dot_dimension_numbers<[1], [0], [0], [1], [0, 0, 1, 1], [], []>} : vector<256x128xbf16>, vector<128x128xbf16>, vector<256x128xf32> -> vector<256x128xf32>
    %c3 = arith.constant 3 : index
    %c0_8 = arith.constant 0 : index
    %c0_9 = arith.constant 0 : index
    %19 = vector.load %arg2[%c3, %c0_8, %c0_9] : memref<6x128x128xbf16, #tpu.memory_space<vmem>>, vector<1x128x128xbf16>
    %20 = vector.shape_cast %19 : vector<1x128x128xbf16> to vector<128x128xbf16>
    %cst_10 = arith.constant dense<0.000000e+00> : vector<256x128xf32>
    %21 = tpu.matmul %15, %20, %cst_10 {dimension_numbers = #tpu.dot_dimension_numbers<[1], [0], [0], [1], [0, 0, 1, 1], [], []>} : vector<256x128xbf16>, vector<128x128xbf16>, vector<256x128xf32> -> vector<256x128xf32>
    %22 = arith.addf %18, %21 : vector<256x128xf32>
    %c0_11 = arith.constant 0 : index
    %c0_12 = arith.constant 0 : index
    %23 = vector.load %arg3[%c0_11, %c0_12] : memref<256x128xf32, #tpu.memory_space<vmem>>, vector<256x128xf32>
    tpu.vector_store %arg3[%c0_11, %c0_12], %22 {strides = array<i32>} : memref<256x128xf32, #tpu.memory_space<vmem>>, vector<256x128xf32>,
    %c0_13 = arith.constant 0 : index
    %c0_14 = arith.constant 0 : index
    %24 = vector.load %arg3[%c0_13, %c0_14] : memref<256x128xf32, #tpu.memory_space<vmem>>, vector<256x128xf32>
    %c1 = arith.constant 1 : index
    %c0_15 = arith.constant 0 : index
    %c0_16 = arith.constant 0 : index
    %25 = vector.load %arg2[%c1, %c0_15, %c0_16] : memref<6x128x128xbf16, #tpu.memory_space<vmem>>, vector<1x128x128xbf16>
    %26 = vector.shape_cast %25 : vector<1x128x128xbf16> to vector<128x128xbf16>
    %cst_17 = arith.constant dense<0.000000e+00> : vector<256x128xf32>
    %27 = tpu.matmul %8, %26, %cst_17 {dimension_numbers = #tpu.dot_dimension_numbers<[1], [0], [0], [1], [0, 0, 1, 1], [], []>} : vector<256x128xbf16>, vector<128x128xbf16>, vector<256x128xf32> -> vector<256x128xf32>
    %c4 = arith.constant 4 : index
    %c0_18 = arith.constant 0 : index
    %c0_19 = arith.constant 0 : index
    %28 = vector.load %arg2[%c4, %c0_18, %c0_19] : memref<6x128x128xbf16, #tpu.memory_space<vmem>>, vector<1x128x128xbf16>
    %29 = vector.shape_cast %28 : vector<1x128x128xbf16> to vector<128x128xbf16>
    %cst_20 = arith.constant dense<0.000000e+00> : vector<256x128xf32>
    %30 = tpu.matmul %15, %29, %cst_20 {dimension_numbers = #tpu.dot_dimension_numbers<[1], [0], [0], [1], [0, 0, 1, 1], [], []>} : vector<256x128xbf16>, vector<128x128xbf16>, vector<256x128xf32> -> vector<256x128xf32>
    %31 = arith.addf %27, %30 : vector<256x128xf32>
    %32 = arith.addf %24, %31 : vector<256x128xf32>
    %c0_21 = arith.constant 0 : index
    %c0_22 = arith.constant 0 : index
    %33 = vector.load %arg3[%c0_21, %c0_22] : memref<256x128xf32, #tpu.memory_space<vmem>>, vector<256x128xf32>
    tpu.vector_store %arg3[%c0_21, %c0_22], %32 {strides = array<i32>} : memref<256x128xf32, #tpu.memory_space<vmem>>, vector<256x128xf32>,
    %c0_23 = arith.constant 0 : index
    %c0_24 = arith.constant 0 : index
    %34 = vector.load %arg3[%c0_23, %c0_24] : memref<256x128xf32, #tpu.memory_space<vmem>>, vector<256x128xf32>
    %c2 = arith.constant 2 : index
    %c0_25 = arith.constant 0 : index
    %c0_26 = arith.constant 0 : index
    %35 = vector.load %arg2[%c2, %c0_25, %c0_26] : memref<6x128x128xbf16, #tpu.memory_space<vmem>>, vector<1x128x128xbf16>
    %36 = vector.shape_cast %35 : vector<1x128x128xbf16> to vector<128x128xbf16>
    %cst_27 = arith.constant dense<0.000000e+00> : vector<256x128xf32>
    %37 = tpu.matmul %8, %36, %cst_27 {dimension_numbers = #tpu.dot_dimension_numbers<[1], [0], [0], [1], [0, 0, 1, 1], [], []>} : vector<256x128xbf16>, vector<128x128xbf16>, vector<256x128xf32> -> vector<256x128xf32>
    %c5 = arith.constant 5 : index
    %c0_28 = arith.constant 0 : index
    %c0_29 = arith.constant 0 : index
    %38 = vector.load %arg2[%c5, %c0_28, %c0_29] : memref<6x128x128xbf16, #tpu.memory_space<vmem>>, vector<1x128x128xbf16>
    %39 = vector.shape_cast %38 : vector<1x128x128xbf16> to vector<128x128xbf16>
    %cst_30 = arith.constant dense<0.000000e+00> : vector<256x128xf32>
    %40 = tpu.matmul %15, %39, %cst_30 {dimension_numbers = #tpu.dot_dimension_numbers<[1], [0], [0], [1], [0, 0, 1, 1], [], []>} : vector<256x128xbf16>, vector<128x128xbf16>, vector<256x128xf32> -> vector<256x128xf32>
    %41 = arith.addf %37, %40 : vector<256x128xf32>
    %42 = arith.addf %34, %41 : vector<256x128xf32>
    %c0_31 = arith.constant 0 : index
    %c0_32 = arith.constant 0 : index
    %43 = vector.load %arg3[%c0_31, %c0_32] : memref<256x128xf32, #tpu.memory_space<vmem>>, vector<256x128xf32>
    tpu.vector_store %arg3[%c0_31, %c0_32], %42 {strides = array<i32>} : memref<256x128xf32, #tpu.memory_space<vmem>>, vector<256x128xf32>,
    return
  }
  func.func @transform_0(%arg0: i32) -> (i32, i32) {
    %c0_i32 = arith.constant 0 : i32
    %c0_i32_0 = arith.constant 0 : i32
    return %arg0, %c0_i32 : i32, i32
  }
  func.func @transform_1(%arg0: i32) -> (i32, i32, i32) {
    %c0_i32 = arith.constant 0 : i32
    %c0_i32_0 = arith.constant 0 : i32
    %c0_i32_1 = arith.constant 0 : i32
    %c0_i32_2 = arith.constant 0 : i32
    return %c0_i32, %c0_i32_0, %c0_i32_1 : i32, i32, i32
  }
  func.func @transform_2(%arg0: i32) -> (i32, i32) {
    %c0_i32 = arith.constant 0 : i32
    %c0_i32_0 = arith.constant 0 : i32
    return %arg0, %c0_i32 : i32, i32
  }
}

</mosaic_0001>

<bundles_post_ra>
// kernel: tpu_custom_call.1
= control target key start
LH: loop header
LB: loop body
LE: loop exit
PB: predicated region body
PF: predicated region fallthrough
CT: control target
= control target key end

     0   :  { %7 = vsyncpa [#allocation3], 0  ;;  %s3775_s0 = inlined_call_operand.vmem [shape: s32[256,2], index: 0, kind: input, shape index: {}]   ;;  %s3776_s1 = inlined_call_operand.hbm [shape: bf16[6,128,128], index: 1, kind: input, shape index: {}]   ;;  %s3777_s2 = inlined_call_operand.hbm [shape: f32[256,128], index: 2, kind: output, shape index: {}]  }
   0x1   :  { %8 = vsyncpa [#allocation4], 0  ;;  %s3044_s9 = smov [#allocation2]   ;;  %s2996_s13 = scalar_lea.hbm %s3776_s1, 6144 }
   0x2   :  { %s16_s10 = sshll.u32 %s3044_s9, 4  ;;  %p2997_p0 = scmp.ne.s32.totalorder %s3776_s1, %s2996_s13  ;;  %s17_s10 = int_to_ptr.vmem [resolvable:$true] %s16_s10 }
   0x3   :  { %p3000_p1 = scmp.lt.u32.totalorder %s2996_s13, %s3776_s1 }
   0x5   :  { %p3002_p2 = pnand %p3000_p1, %p2997_p0 }
   0x7   :  { %3005 = shalt.err (!%p3002_p2)
}
   0x8   :  { %s3006_s18 = scalar_lea.vmem %s17_s10, 6144  ;;  %p3011_p4 = scmp.lt.s32.totalorder %s17_s10, %s17_s10 }
   0x9   :  { %p3007_p3 = scmp.ne.s32.totalorder %s17_s10, %s3006_s18  ;;  %p3012_p5 = scmp.lt.s32.totalorder %s3006_s18, %s3006_s18 }
   0xb   :  { %p3013_p6 = por %p3012_p5, %p3011_p4 }
   0xd   :  { %p3014_p7 = pnand %p3013_p6, %p3007_p3 }
   0xf   :  { %3017 = shalt.err (!%p3014_p7)
}
  0x10   :  { %s3045_s19 = smov 64   ;;  %s3046_s20 = smov 4  }
  0x11   :  { %22 = dma.hbm_to_vmem [thread:$0]  %s3776_s1, 6144, %s17_s10, [#allocation3], %s3045_s19, %s3045_s19, %s3046_s20  }
  0x12   :  { %3040 = dma.done.wait [#allocation3], 6144  }
  0x13   :  { %3041 = vsyncadd [#allocation3], 4294961152  ;;  %v3047_v0 = vmov 1   ;;  %v3048_v1 = vmov 0   ;;  %v29_v2 = vld [vmem:[%s3775_s0 + $0x10] sm:$0xff]  ;;  %v27_v3 = vld [vmem:[%s3775_s0] sm:$0xff]  ;;  %v59_v53 = vlaneseq }
  0x14   :  { %2914 = vset.pattern.permute.xlu1 %v3047_v0  ;;  %2915 = vset.pattern.permute.xlu0 %v3048_v1  ;;  %v30_v4 = vld [vmem:[%s3775_s0 + $0x18] sm:$0xff]  ;;  %v31_v5 = vld [vmem:[%s3775_s0 + $0x20] sm:$0xff]  ;;  %v28_v7 = vld [vmem:[%s3775_s0 + $0x8] sm:$0xff]  ;;  %v3049_v60 = vmov 1.0|1.0  }
  0x15   :  { %244 = vperm.xlu1 %2914, %v29_v2   ;;  %62 = vperm.xlu0 %2915, %v27_v3   ;;  %v3097_v6 = vld [vmem:[%s3775_s0 + $0x40] sm:$0xff]  ;;  %v2949_v10 = vld [vmem:[#allocation2 + $0x48] sm:$0xff]   ;;  %v2950_v13 = vld [vmem:[#allocation2 + $0x50] sm:$0xff]   ;;  %v3239_v56 = vand.u32 127, %v59_v53 }
  0x16   :  { %v3107_v8 = vld [vmem:[%s3775_s0 + $0x60] sm:$0xff]  ;;  %v2953_v14 = vld [vmem:[#allocation2 + $0xc8] sm:$0xff]   ;;  %v2952_v16 = vld [vmem:[#allocation2 + $0x58] sm:$0xff]  }
  0x17   :  { %v2948_v9 = vld [vmem:[#allocation2 + $0x40] sm:$0xff]   ;;  %v2955_v17 = vld [vmem:[#allocation2 + $0xd0] sm:$0xff]   ;;  %v2957_v20 = vld [vmem:[#allocation2 + $0xd8] sm:$0xff]  }
  0x18   :  { %v3112_v11 = vld [vmem:[%s3775_s0 + $0x80] sm:$0xff]  ;;  %2537 = vmatprep.subr.bf16.mxu0 %v2948_v9  ;;  %v34_v21 = vld [vmem:[%s3775_s0 + $0x38] sm:$0xff]  ;;  %v2956_v22 = vld [vmem:[#allocation2 + $0x68] sm:$0xff]  }
  0x19   :  { %247 = vperm.xlu1 %2914, %v30_v4   ;;  %74 = vperm.xlu0 %2915, %v31_v5   ;;  %v2951_v12 = vld [vmem:[#allocation2 + $0xc0] sm:$0xff]   ;;  %v2961_v24 = vld [vmem:[#allocation2 + $0xe8] sm:$0xff]   ;;  %v2958_v26 = vld [vmem:[#allocation2 + $0x70] sm:$0xff]  }
  0x1a   :  { %2538 = vmatpush3.bf16.msra.mxu0 %v2948_v9  ;;  %2393 = vmatprep.subr.bf16.mxu1 %v2951_v12  ;;  %v3119_v15 = vld [vmem:[%s3775_s0 + $0xa0] sm:$0xff]  ;;  %v32_v25 = vld [vmem:[%s3775_s0 + $0x28] sm:$0xff]  ;;  %v2962_v27 = vld [vmem:[#allocation2 + $0xf0] sm:$0xff]  }
  0x1b   :  { %2539 = vmatprep.subr.bf16.mxu0 %v2949_v10  ;;  %2394 = vmatpush3.bf16.msra.mxu1 %v2951_v12  ;;  %v3127_v18 = vld [vmem:[%s3775_s0 + $0xc0] sm:$0xff]  ;;  %v2960_v28 = vld [vmem:[#allocation2 + $0x78] sm:$0xff]   ;;  %v33_v30 = vld [vmem:[%s3775_s0 + $0x30] sm:$0xff] }
  0x1c   :  { %2395 = vmatprep.subr.bf16.mxu1 %v2953_v14  ;;  %v2954_v19 = vld [vmem:[#allocation2 + $0x60] sm:$0xff]   ;;  %v2963_v29 = vld [vmem:[#allocation2 + $0xf8] sm:$0xff]   ;;  %v36_v31 = vld [vmem:[%s3775_s0 + $0x48] sm:$0xff] }
  0x1d   :  { %2916 = vset.pattern.permute.xlu1 %v3048_v1  ;;  %86 = vperm.xlu0 %2915, %v3097_v6   ;;  %v2959_v23 = vld [vmem:[#allocation2 + $0xe0] sm:$0xff]   ;;  %v37_v32 = vld [vmem:[%s3775_s0 + $0x50] sm:$0xff]  ;;  %v38_v33 = vld [vmem:[%s3775_s0 + $0x58] sm:$0xff] }
  0x1e   :  { %65 = vperm.xlu1 %2916, %v28_v7   ;;  %2540 = vmatpush3.bf16.msra.mxu0 %v2949_v10  ;;  %v40_v34 = vld [vmem:[%s3775_s0 + $0x68] sm:$0xff]  ;;  %v41_v35 = vld [vmem:[%s3775_s0 + $0x70] sm:$0xff]  ;;  %v42_v40 = vld [vmem:[%s3775_s0 + $0x78] sm:$0xff] }
  0x1f   :  { %2541 = vmatprep.subr.bf16.mxu0 %v2950_v13  ;;  %2396 = vmatpush3.bf16.msra.mxu1 %v2953_v14  ;;  %v44_v36 = vld [vmem:[%s3775_s0 + $0x88] sm:$0xff]  ;;  %v45_v37 = vld [vmem:[%s3775_s0 + $0x90] sm:$0xff]  ;;  %v3212_v45 = vld [vmem:[%s3775_s0 + $0xe0] sm:$0xff] }
  0x20   :  { %2397 = vmatprep.subr.bf16.mxu1 %v2955_v17  ;;  %v48_v38 = vld [vmem:[%s3775_s0 + $0xa8] sm:$0xff]  ;;  %v49_v39 = vld [vmem:[%s3775_s0 + $0xb0] sm:$0xff]  ;;  %v46_v46 = vld [vmem:[%s3775_s0 + $0x98] sm:$0xff] }
  0x21   :  { %98 = vperm.xlu0 %2915, %v3107_v8   ;;  %v3183_v41 = vld [vmem:[%s3775_s0 + $0xc8] sm:$0xff]  ;;  %v3190_v42 = vld [vmem:[%s3775_s0 + $0xd0] sm:$0xff]  ;;  %v3222_v47 = vld [vmem:[%s3775_s0 + $0xf8] sm:$0xff] }
  0x22   :  { %2917 = vset.pattern.permute.xlu1 %v3047_v0  ;;  %2542 = vmatpush3.bf16.msra.mxu0 %v2950_v13  ;;  %v3197_v43 = vld [vmem:[%s3775_s0 + $0xe8] sm:$0xff]  ;;  %v3205_v44 = vld [vmem:[%s3775_s0 + $0xf0] sm:$0xff]  ;;  %v3231_v48 = vld [vmem:[#allocation2] sm:$0xff]  }
  0x23   :  { %250 = vperm.xlu1 %2917, %v31_v5   ;;  %2543 = vmatprep.subr.bf16.mxu0 %v2952_v16  ;;  %v50_v49 = vld [vmem:[%s3775_s0 + $0xb8] sm:$0xff]  ;;  %v2966_v50 = vld [vmem:[#allocation2 + $0x140] sm:$0xff]   ;;  %v2970_v10 = vld [vmem:[#allocation2 + $0x150] sm:$0xff]  }
  0x24   :  { %2398 = vmatpush3.bf16.msra.mxu1 %v2955_v17  ;;  %v2972_v14 = vld [vmem:[#allocation2 + $0x158] sm:$0xff]  }
  0x25   :  { %110 = vperm.xlu0 %2915, %v3112_v11   ;;  %2399 = vmatprep.subr.bf16.mxu1 %v2957_v20 }
  0x26   :  { %2544 = vmatpush3.bf16.msra.mxu0 %v2952_v16 }
  0x27   :  { %2918 = vset.pattern.permute.xlu1 %v3048_v1  ;;  %2545 = vmatprep.subr.bf16.mxu0 %v2954_v19 }
  0x28   :  { %68 = vperm.xlu1 %2918, %v29_v2   ;;  %2400 = vmatpush3.bf16.msra.mxu1 %v2957_v20  ;;  %v54_v2 = vld [vmem:[%s3775_s0 + $0xd8] sm:$0xff]  ;;  %v2974_v20 = vld [vmem:[#allocation2 + $0x160] sm:$0xff]   ;;  %s3050_s0 = smov [#allocation5]  }
  0x29   :  { %122 = vperm.xlu0 %2915, %v3119_v15   ;;  %2401 = vmatprep.subr.bf16.mxu1 %v2959_v23  ;;  %s1997_s28 = sshll.u32 %s3050_s0, 4  ;;  %s1998_s28 = int_to_ptr.vmem [resolvable:$true] %s1997_s28 }
  0x2a   :  { %2546 = vmatpush3.bf16.msra.mxu0 %v2954_v19  ;;  %v2965_v19 = vld [vmem:[#allocation2 + $0x8] sm:$0xff]   ;;  %s3018_s29 = scalar_lea.vmem %s1998_s28, 4096  ;;  %p3023_p9 = scmp.lt.s32.totalorder %s1998_s28, %s1998_s28 }
  0x2b   :  { %2547 = vmatprep.subr.bf16.mxu0 %v2956_v22  ;;  %p3019_p8 = scmp.ne.s32.totalorder %s1998_s28, %s3018_s29  ;;  %p3024_p10 = scmp.lt.s32.totalorder %s3018_s29, %s3018_s29 }
  0x2c   :  { %71 = vperm.xlu1 %2918, %v30_v4   ;;  %2402 = vmatpush3.bf16.msra.mxu1 %v2959_v23  ;;  %v2967_v23 = vld [vmem:[#allocation2 + $0x10] sm:$0xff]  }
  0x2d   :  { %134 = vperm.xlu0 %2915, %v3127_v18   ;;  %2403 = vmatprep.subr.bf16.mxu1 %v2961_v24  ;;  %p3025_p11 = por %p3024_p10, %p3023_p9 }
  0x2e   :  { %2548 = vmatpush3.bf16.msra.mxu0 %v2956_v22 }
  0x2f   :  { %2549 = vmatprep.subr.bf16.mxu0 %v2958_v26  ;;  %p3026_p12 = pnand %p3025_p11, %p3019_p8 }
  0x30   :  { %2919 = vset.pattern.permute.xlu1 %v3047_v0  ;;  %2404 = vmatpush3.bf16.msra.mxu1 %v2961_v24 }
  0x31   :  { %259 = vperm.xlu1 %2919, %v34_v21   ;;  %2940 = vset.pattern.permute.xlu0 %v3047_v0 }
  0x32   :  { %238 = vperm.xlu0 %2940, %v27_v3   ;;  %2405 = vmatprep.subr.bf16.mxu1 %v2962_v27 }
  0x33   :  { %2550 = vmatpush3.bf16.msra.mxu0 %v2958_v26  ;;  %v3836_v26 = vmov 0 }
  0x34   :  { %2551 = vmatprep.subr.bf16.mxu0 %v2960_v28  ;;  %2406 = vmatpush3.bf16.msra.mxu1 %v2962_v27 }
  0x35   :  { %2920 = vset.pattern.permute.xlu1 %v3048_v1  ;;  %2407 = vmatprep.subr.bf16.mxu1 %v2963_v29 }
  0x36   :  { %77 = vperm.xlu1 %2920, %v32_v25   ;;  %241 = vperm.xlu0 %2940, %v28_v7   ;;  %v2968_v7 = vld [vmem:[#allocation2 + $0x148] sm:$0xff]  }
  0x37   :  { %2552 = vmatpush3.bf16.msra.mxu0 %v2960_v28  ;;  %v2969_v28 = vld [vmem:[#allocation2 + $0x18] sm:$0xff]  }
  0x38   :  { %2408 = vmatpush3.bf16.msra.mxu1 %v2963_v29  ;;  %2585 = vmatprep.subr.bf16.mxu0 %v2966_v50 }
  0x39   :  { %2441 = vmatprep.subr.bf16.mxu1 %v3231_v48 }
  0x3a   :  { %2921 = vset.pattern.permute.xlu1 %v3047_v0  ;;  %253 = vperm.xlu0 %2940, %v32_v25   ;;  %v2976_v25 = vld [vmem:[#allocation2 + $0x168] sm:$0xff]  }
  0x3b   :  { %262 = vperm.xlu1 %2921, %v3097_v6  }
  0x3e   :  { %256 = vperm.xlu0 %2940, %v33_v30  }
  0x3f   :  { %2922 = vset.pattern.permute.xlu1 %v3048_v1 }
  0x40   :  { %80 = vperm.xlu1 %2922, %v33_v30   ;;  %v3838_v30 = vmov 0 }
  0x42   :  { %265 = vperm.xlu0 %2940, %v36_v31  }
  0x44   :  { %83 = vperm.xlu1 %2922, %v34_v21  }
  0x46   :  { %268 = vperm.xlu0 %2940, %v37_v32  }
  0x48   :  { %2923 = vset.pattern.permute.xlu1 %v3047_v0 }
  0x49   :  { %271 = vperm.xlu1 %2923, %v38_v33  }
  0x4a   :  { %277 = vperm.xlu0 %2940, %v40_v34  }
  0x4d   :  { %2924 = vset.pattern.permute.xlu1 %v3048_v1 }
  0x4e   :  { %89 = vperm.xlu1 %2924, %v36_v31   ;;  %280 = vperm.xlu0 %2940, %v41_v35  }
  0x52   :  { %2925 = vset.pattern.permute.xlu1 %v3047_v0  ;;  %289 = vperm.xlu0 %2940, %v44_v36  }
  0x53   :  { %274 = vperm.xlu1 %2925, %v3107_v8  }
  0x56   :  { %292 = vperm.xlu0 %2940, %v45_v37  }
  0x57   :  { %2926 = vset.pattern.permute.xlu1 %v3048_v1 }
  0x58   :  { %92 = vperm.xlu1 %2926, %v37_v32   ;;  %v2971_v32 = vld [vmem:[#allocation2 + $0x20] sm:$0xff]  }
  0x5a   :  { %301 = vperm.xlu0 %2940, %v48_v38  }
  0x5c   :  { %95 = vperm.xlu1 %2926, %v38_v33   ;;  %v3840_v33 = vmov 0 }
  0x5e   :  { %304 = vperm.xlu0 %2940, %v49_v39  }
  0x60   :  { %2927 = vset.pattern.permute.xlu1 %v3047_v0 }
  0x61   :  { %283 = vperm.xlu1 %2927, %v42_v40  }
  0x62   :  { %313 = vperm.xlu0 %2940, %v3183_v41  }
  0x65   :  { %2928 = vset.pattern.permute.xlu1 %v3048_v1 }
  0x66   :  { %101 = vperm.xlu1 %2928, %v40_v34   ;;  %316 = vperm.xlu0 %2940, %v3190_v42  }
  0x6a   :  { %2929 = vset.pattern.permute.xlu1 %v3047_v0  ;;  %325 = vperm.xlu0 %2940, %v3197_v43  }
  0x6b   :  { %286 = vperm.xlu1 %2929, %v3112_v11  }
  0x6e   :  { %328 = vperm.xlu0 %2940, %v3205_v44  }
  0x6f   :  { %2930 = vset.pattern.permute.xlu1 %v3048_v1 }
  0x70   :  { %104 = vperm.xlu1 %2930, %v41_v35  }
  0x72   :  { %2945 = vset.pattern.permute.xlu0 %v3048_v1 }
  0x73   :  { %146 = vperm.xlu0 %2945, %v3212_v45  }
  0x74   :  { %107 = vperm.xlu1 %2930, %v42_v40  }
  0x77   :  { %155 = vperm.xlu0 %2945, %v3222_v47  }
  0x78   :  { %2931 = vset.pattern.permute.xlu1 %v3047_v0 }
  0x79   :  { %295 = vperm.xlu1 %2931, %v46_v46  }
  0x7b   :  { %2947 = vset.pattern.permute.xlu0 %v3047_v0 }
  0x7d   :  { %2932 = vset.pattern.permute.xlu1 %v3048_v1 }
  0x7e   :  { %113 = vperm.xlu1 %2932, %v44_v36   ;;  %v2973_v36 = vld [vmem:[#allocation2 + $0x28] sm:$0xff]  }
  0x82   :  { %2933 = vset.pattern.permute.xlu1 %v3047_v0 }
  0x83   :  { %298 = vperm.xlu1 %2933, %v3119_v15  }
  0x87   :  { %2934 = vset.pattern.permute.xlu1 %v3048_v1 }
  0x88   :  { %116 = vperm.xlu1 %2934, %v45_v37   ;;  %v3842_v37 = vmov 0 }
  0x8c   :  { %119 = vperm.xlu1 %2934, %v46_v46   ;;  %v3381_v46 = vld [vmem:[#allocation2 + $0x100] sm:$0xff]  }
  0x90   :  { %2935 = vset.pattern.permute.xlu1 %v3047_v0 }
  0x91   :  { %307 = vperm.xlu1 %2935, %v50_v49  }
  0x94   :  { %v245_v51 = vpop.permute.xlu1 %244  ;;  %v63_v52 = vpop.permute.xlu0 %62 }
  0x95   :  { %2936 = vset.pattern.permute.xlu1 %v3048_v1  ;;  %vm157_vm0 = vcmp.eq.s32.totalorder %v63_v52, %v3239_v56  ;;  %vm335_vm12 = vcmp.eq.s32.totalorder %v245_v51, %v3239_v56  ;;  %v3850_v52 = vmov 0 }
  0x96   :  { %125 = vperm.xlu1 %2936, %v48_v38  }
  0x98   :  { %v248_v54 = vpop.permute.xlu1 %247  ;;  %v75_v55 = vpop.permute.xlu0 %74 }
  0x99   :  { %vm161_vm6 = vcmp.eq.s32.totalorder %v75_v55, %v3239_v56  ;;  %vm336_vm8 = vcmp.eq.s32.totalorder %v248_v54, %v3239_v56  ;;  %v3852_v54 = vmov 0 }
  0x9a   :  { %2937 = vset.pattern.permute.xlu1 %v3047_v0  ;;  %vm3299_vm14 = vmpackc.low %vm336_vm8, %vm335_vm12 }
  0x9b   :  { %310 = vperm.xlu1 %2937, %v3127_v18  }
  0x9c   :  { %v3244_v57 = vpop.permute.xlu0 %86 }
  0x9d   :  { %v66_v58 = vpop.permute.xlu1 %65 }
  0x9e   :  { %vm158_vm1 = vcmp.eq.s32.totalorder %v66_v58, %v3239_v56  ;;  %v3854_v58 = vmov 0 }
  0x9f   :  { %vm3247_vm2 = vmpackc.low %vm158_vm1, %vm157_vm0  ;;  %2938 = vset.pattern.permute.xlu1 %v3048_v1 }
  0xa0   :  { %128 = vperm.xlu1 %2938, %v49_v39   ;;  %2553 = vmatprep.mubr.msk.bf16.mxu0 %vm3247_vm2, %v3049_v60  ;;  %v3255_v61 = vpop.permute.xlu0 %98  ;;  %v2975_v39 = vld [vmem:[#allocation2 + $0x30] sm:$0xff]  }
  0xa2   :  { %v251_v62 = vpop.permute.xlu1 %250 }
  0xa3   :  { %vm337_vm15 = vcmp.eq.s32.totalorder %v251_v62, %v3239_v56 }
  0xa4   :  { %131 = vperm.xlu1 %2938, %v50_v49   ;;  %v3257_v63 = vpop.permute.xlu0 %110 }
  0xa7   :  { %v69_v3 = vpop.permute.xlu1 %68 }
  0xa8   :  { %2939 = vset.pattern.permute.xlu1 %v3047_v0  ;;  %v3263_v4 = vpop.permute.xlu0 %122  ;;  %vm159_vm3 = vcmp.eq.s32.totalorder %v69_v3, %v3239_v56 }
  0xa9   :  { %319 = vperm.xlu1 %2939, %v54_v2  }
  0xab   :  { %v72_v5 = vpop.permute.xlu1 %71 }
  0xac   :  { %vm160_vm4 = vcmp.eq.s32.totalorder %v72_v5, %v3239_v56  ;;  %v3267_v6 = vpop.permute.xlu0 %134 }
  0xad   :  { %vm3269_vm5 = vmpackc.low %vm160_vm4, %vm159_vm3  ;;  %2941 = vset.pattern.permute.xlu1 %v3048_v1 }
  0xae   :  { %137 = vperm.xlu1 %2941, %v3183_v41   ;;  %2554 = vmatmul.mubr.msk.bf16.vlgmr.msra.gmra.mrb[0].mxu0 %vm3269_vm5, %v3049_v60  ;;  %v3844_v41 = vmov 0 }
  0xaf   :  { %2586 = vmatpush3.bf16.msra.mxu0 %v2966_v50  ;;  %v3848_v50 = vmov 0 }
  0xb0   :  { %v260_v9 = vpop.permute.xlu1 %259  ;;  %2587 = vmatprep.subr.bf16.mxu0 %v2968_v7 }
  0xb1   :  { %v239_v11 = vpop.permute.xlu0 %238  ;;  %vm340_vm3 = vcmp.eq.s32.totalorder %v260_v9, %v3239_v56 }
  0xb2   :  { %2942 = vset.pattern.permute.xlu1 %v3047_v0  ;;  %vm333_vm7 = vcmp.eq.s32.totalorder %v239_v11, %v3239_v56 }
  0xb3   :  { %322 = vperm.xlu1 %2942, %v3212_v45   ;;  %2588 = vmatpush3.bf16.msra.mxu0 %v2968_v7  ;;  %v3846_v45 = vmov 0  ;;  %v3858_v7 = vmov 0 }
  0xb4   :  { %2589 = vmatprep.subr.bf16.mxu0 %v2970_v10 }
  0xb5   :  { %v78_v12 = vpop.permute.xlu1 %77  ;;  %v242_v13 = vpop.permute.xlu0 %241 }
  0xb6   :  { %vm162_vm9 = vcmp.eq.s32.totalorder %v78_v12, %v3239_v56  ;;  %vm334_vm10 = vcmp.eq.s32.totalorder %v242_v13, %v3239_v56  ;;  %v3862_v13 = vmov 0 }
  0xb7   :  { %vm3285_vm11 = vmpackc.low %vm162_vm9, %vm161_vm6  ;;  %2943 = vset.pattern.permute.xlu1 %v3048_v1  ;;  %2590 = vmatpush3.bf16.msra.mxu0 %v2970_v10  ;;  %v3860_v10 = vmov 0 }
  0xb8   :  { %vm3291_vm13 = vmpackc.low %vm334_vm10, %vm333_vm7  ;;  %140 = vperm.xlu1 %2943, %v3190_v42   ;;  %2557 = vmatprep.mubr.msk.bf16.mxu0 %vm3285_vm11, %v3049_v60  ;;  %v2977_v42 = vld [vmem:[#allocation2 + $0x38] sm:$0xff]  }
  0xb9   :  { %2409 = vmatprep.mubr.msk.bf16.mxu1 %vm3291_vm13, %v3049_v60  ;;  %v254_v18 = vpop.permute.xlu0 %253  ;;  %2591 = vmatprep.subr.bf16.mxu0 %v2972_v14 }
  0xba   :  { %2410 = vmatmul.mubr.msk.bf16.vlgmr.msra.gmra.mrb[0].mxu1 %vm3299_vm14, %v3049_v60  ;;  %vm338_vm0 = vcmp.eq.s32.totalorder %v254_v18, %v3239_v56  ;;  %v263_v21 = vpop.permute.xlu1 %262  ;;  %v3864_v18 = vmov 0 }
  0xbb   :  { %vm3311_vm1 = vmpackc.low %vm338_vm0, %vm337_vm15  ;;  %2442 = vmatpush3.bf16.msra.mxu1 %v3231_v48  ;;  %2592 = vmatpush3.bf16.msra.mxu0 %v2972_v14  ;;  %vm341_vm7 = vcmp.eq.s32.totalorder %v263_v21, %v3239_v56  ;;  %v3866_v21 = vmov 0 }
  0xbc   :  { %143 = vperm.xlu1 %2943, %v54_v2   ;;  %2413 = vmatprep.mubr.msk.bf16.mxu1 %vm3311_vm1, %v3049_v60  ;;  %v3856_v2 = vmov 0 }
  0xbd   :  { %v257_v24 = vpop.permute.xlu0 %256  ;;  %2443 = vmatprep.subr.bf16.mxu1 %v2965_v19  ;;  %2593 = vmatprep.subr.bf16.mxu0 %v2974_v20 }
  0xbe   :  { %vm339_vm4 = vcmp.eq.s32.totalorder %v257_v24, %v3239_v56  ;;  %v3868_v24 = vmov 0 }
  0xbf   :  { %vm3321_vm6 = vmpackc.low %vm340_vm3, %vm339_vm4  ;;  %v81_v27 = vpop.permute.xlu1 %80  ;;  %2444 = vmatpush3.bf16.msra.mxu1 %v2965_v19  ;;  %2594 = vmatpush3.bf16.msra.mxu0 %v2974_v20 }
  0xc0   :  { %v3837_v26 = vsel %vm3321_vm6, 4294967295, %v3836_v26  ;;  %2944 = vset.pattern.permute.xlu1 %v3047_v0  ;;  %2445 = vmatprep.subr.bf16.mxu1 %v2967_v23  ;;  %v2978_v0 = vld [vmem:[#allocation2 + $0x170] sm:$0xff]   ;;  %vm163_vm10 = vcmp.eq.s32.totalorder %v81_v27, %v3239_v56 }
  0xc1   :  { %331 = vperm.xlu1 %2944, %v3222_v47   ;;  %v266_v29 = vpop.permute.xlu0 %265  ;;  %2595 = vmatprep.subr.bf16.mxu0 %v2976_v25 }
  0xc2   :  { %2414 = vmatmul.mubr.msk.bf16.gmra.mrb[4].mxu1 %vm3321_vm6, %v3049_v60  ;;  %vm342_vm8 = vcmp.eq.s32.totalorder %v266_v29, %v3239_v56 }
  0xc3   :  { %vm3332_vm9 = vmpackc.low %vm342_vm8, %vm341_vm7  ;;  %v84_v31 = vpop.permute.xlu1 %83  ;;  %2446 = vmatpush3.bf16.msra.mxu1 %v2967_v23  ;;  %2596 = vmatpush3.bf16.msra.mxu0 %v2976_v25  ;;  %vm165_vm7 = vcmp.eq.s32.totalorder %v3244_v57, %v3239_v56 }
  0xc4   :  { %v3839_v30 = vsel %vm3332_vm9, 4294967295, %v3838_v30  ;;  %vm164_vm12 = vcmp.eq.s32.totalorder %v84_v31, %v3239_v56  ;;  %2417 = vmatprep.mubr.msk.bf16.mxu1 %vm3332_vm9, %v3049_v60  ;;  %2447 = vmatprep.subr.bf16.mxu1 %v2969_v28  ;;  %v3872_v31 = vmov 0 }
  0xc5   :  { %vm3341_vm15 = vmpackc.low %vm164_vm12, %vm163_vm10  ;;  %2946 = vset.pattern.permute.xlu1 %v3048_v1  ;;  %v269_v34 = vpop.permute.xlu0 %268  ;;  %2597 = vmatprep.subr.bf16.mxu0 %v2978_v0  ;;  %v2980_v1 = vld [vmem:[#allocation2 + $0x178] sm:$0xff]  }
  0xc6   :  { %v3841_v33 = vsel %vm3341_vm15, 4294967295, %v3840_v33  ;;  %149 = vperm.xlu1 %2946, %v3197_v43   ;;  %2558 = vmatmul.mubr.msk.bf16.gmra.mrb[4].mxu0 %vm3341_vm15, %v3049_v60  ;;  %vm343_vm0 = vcmp.eq.s32.totalorder %v269_v34, %v3239_v56  ;;  %v3874_v34 = vmov 0 }
  0xc7   :  { %2448 = vmatpush3.bf16.msra.mxu1 %v2969_v28  ;;  %2598 = vmatpush3.bf16.msra.mxu0 %v2978_v0  ;;  %v3870_v28 = vmov 0 }
  0xc8   :  { %v272_v35 = vpop.permute.xlu1 %271  ;;  %2449 = vmatprep.subr.bf16.mxu1 %v2971_v32  ;;  %2599 = vmatprep.subr.bf16.mxu0 %v2980_v1 }
  0xc9   :  { %vm344_vm3 = vcmp.eq.s32.totalorder %v272_v35, %v3239_v56  ;;  %v278_v40 = vpop.permute.xlu0 %277 }
  0xca   :  { %vm3352_vm4 = vmpackc.low %vm344_vm3, %vm343_vm0  ;;  %152 = vperm.xlu1 %2946, %v3205_v44   ;;  %vm346_vm12 = vcmp.eq.s32.totalorder %v278_v40, %v3239_v56  ;;  %v3372_v44 = vld [vmem:[#allocation2 + $0x80] sm:$0xff]  }
  0xcb   :  { %v3843_v37 = vsel %vm3352_vm4, 4294967295, %v3842_v37  ;;  %2418 = vmatmul.mubr.msk.bf16.gmra.mrb[8].mxu1 %vm3352_vm4, %v3049_v60  ;;  %2600 = vmatpush3.bf16.msra.mxu0 %v2980_v1 }
  0xcc   :  { %2450 = vmatpush3.bf16.msra.mxu1 %v2971_v32  ;;  %2633 = vmatprep.subr.bf16.mxu0 %v3372_v44 }
  0xcd   :  { %v90_v38 = vpop.permute.xlu1 %89  ;;  %2451 = vmatprep.subr.bf16.mxu1 %v2973_v36  ;;  %v281_v49 = vpop.permute.xlu0 %280 }
  0xce   :  { %vm166_vm8 = vcmp.eq.s32.totalorder %v90_v38, %v3239_v56 }
  0xcf   :  { %vm3363_vm10 = vmpackc.low %vm166_vm8, %vm165_vm7 }
  0xd0   :  { %v3845_v41 = vsel %vm3363_vm10, 4294967295, %v3844_v41  ;;  %2561 = vmatprep.mubr.msk.bf16.mxu0 %vm3363_vm10, %v3049_v60  ;;  %2452 = vmatpush3.bf16.msra.mxu1 %v2973_v36  ;;  %v3876_v36 = vmov 0 }
  0xd1   :  { %2453 = vmatprep.subr.bf16.mxu1 %v2975_v39  ;;  %v290_v55 = vpop.permute.xlu0 %289 }
  0xd2   :  { %v275_v43 = vpop.permute.xlu1 %274 }
  0xd3   :  { %vm345_vm0 = vcmp.eq.s32.totalorder %v275_v43, %v3239_v56  ;;  %v3880_v43 = vmov 0 }
  0xd4   :  { %vm3374_vm3 = vmpackc.low %vm346_vm12, %vm345_vm0  ;;  %2454 = vmatpush3.bf16.msra.mxu1 %v2975_v39  ;;  %vm347_vm0 = vcmp.eq.s32.totalorder %v281_v49, %v3239_v56  ;;  %v3878_v39 = vmov 0  ;;  %v3882_v49 = vmov 0 }
  0xd5   :  { %v3847_v45 = vsel %vm3374_vm3, 4294967295, %v3846_v45  ;;  %2421 = vmatprep.mubr.msk.bf16.mxu1 %vm3374_vm3, %v3049_v60  ;;  %2455 = vmatprep.subr.bf16.mxu1 %v2977_v42  ;;  %v293_v3 = vpop.permute.xlu0 %292 }
  0xd7   :  { %v93_v47 = vpop.permute.xlu1 %92 }
  0xd8   :  { %2456 = vmatpush3.bf16.msra.mxu1 %v2977_v42  ;;  %vm167_vm7 = vcmp.eq.s32.totalorder %v93_v47, %v3239_v56 }
  0xd9   :  { %2489 = vmatprep.subr.bf16.mxu1 %v3381_v46  ;;  %v302_v11 = vpop.permute.xlu0 %301 }
  0xdb   :  { %v96_v48 = vpop.permute.xlu1 %95 }
  0xdc   :  { %vm168_vm8 = vcmp.eq.s32.totalorder %v96_v48, %v3239_v56 }
  0xdd   :  { %vm3387_vm12 = vmpackc.low %vm168_vm8, %vm167_vm7  ;;  %vm169_vm7 = vcmp.eq.s32.totalorder %v3255_v61, %v3239_v56  ;;  %v305_v19 = vpop.permute.xlu0 %304 }
  0xde   :  { %v3849_v50 = vsel %vm3387_vm12, 4294967295, %v3848_v50  ;;  %2562 = vmatmul.mubr.msk.bf16.gmra.mrb[8].mxu0 %vm3387_vm12, %v3049_v60 }
  0xe0   :  { %v284_v51 = vpop.permute.xlu1 %283 }
  0xe1   :  { %vm348_vm3 = vcmp.eq.s32.totalorder %v284_v51, %v3239_v56  ;;  %v314_v25 = vpop.permute.xlu0 %313 }
  0xe2   :  { %vm3396_vm4 = vmpackc.low %vm348_vm3, %vm347_vm0  ;;  %vm350_vm3 = vcmp.eq.s32.totalorder %v290_v55, %v3239_v56 }
  0xe3   :  { %v3851_v52 = vsel %vm3396_vm4, 4294967295, %v3850_v52  ;;  %2422 = vmatmul.mubr.msk.bf16.gmra.mrb[12].mxu1 %vm3396_vm4, %v3049_v60 }
  0xe5   :  { %v102_v53 = vpop.permute.xlu1 %101  ;;  %v317_v0 = vpop.permute.xlu0 %316 }
  0xe6   :  { %vm170_vm8 = vcmp.eq.s32.totalorder %v102_v53, %v3239_v56  ;;  %v3884_v53 = vmov 0 }
  0xe7   :  { %vm3406_vm9 = vmpackc.low %vm170_vm8, %vm169_vm7 }
  0xe8   :  { %v3853_v54 = vsel %vm3406_vm9, 4294967295, %v3852_v54  ;;  %2565 = vmatprep.mubr.msk.bf16.mxu0 %vm3406_vm9, %v3049_v60 }
  0xe9   :  { %v326_v1 = vpop.permute.xlu0 %325 }
  0xea   :  { %v287_v57 = vpop.permute.xlu1 %286 }
  0xeb   :  { %vm349_vm0 = vcmp.eq.s32.totalorder %v287_v57, %v3239_v56 }
  0xec   :  { %vm3415_vm4 = vmpackc.low %vm350_vm3, %vm349_vm0  ;;  %vm351_vm3 = vcmp.eq.s32.totalorder %v293_v3, %v3239_v56  ;;  %v2985_v3 = vld [vmem:[#allocation2 + $0x118] sm:$0xff]  }
  0xed   :  { %v3855_v58 = vsel %vm3415_vm4, 4294967295, %v3854_v58  ;;  %2425 = vmatprep.mubr.msk.bf16.mxu1 %vm3415_vm4, %v3049_v60  ;;  %v329_v42 = vpop.permute.xlu0 %328 }
  0xef   :  { %v105_v61 = vpop.permute.xlu1 %104 }
  0xf0   :  { %vm171_vm7 = vcmp.eq.s32.totalorder %v105_v61, %v3239_v56  ;;  %v2981_v61 = vld [vmem:[#allocation2 + $0x108] sm:$0xff]  }
  0xf2   :  { %v147_v48 = vpop.permute.xlu0 %146 }
  0xf3   :  { %v108_v62 = vpop.permute.xlu1 %107 }
  0xf4   :  { %vm172_vm8 = vcmp.eq.s32.totalorder %v108_v62, %v3239_v56  ;;  %v3886_v62 = vmov 0 }
  0xf5   :  { %vm3424_vm6 = vmpackc.low %vm172_vm8, %vm171_vm7  ;;  %vm173_vm7 = vcmp.eq.s32.totalorder %v3257_v63, %v3239_v56 }
  0xf6   :  { %v3857_v2 = vsel %vm3424_vm6, 4294967295, %v3856_v2  ;;  %2566 = vmatmul.mubr.msk.bf16.gmra.mrb[12].mxu0 %vm3424_vm6, %v3049_v60  ;;  %v156_v55 = vpop.permute.xlu0 %155 }
  0xf8   :  { %v296_v5 = vpop.permute.xlu1 %295 }
  0xf9   :  { %vm352_vm0 = vcmp.eq.s32.totalorder %v296_v5, %v3239_v56  ;;  %v2984_v5 = vld [vmem:[#allocation2 + $0x88] sm:$0xff]  }
  0xfa   :  { %vm3433_vm4 = vmpackc.low %vm352_vm0, %vm351_vm3  ;;  %vm354_vm3 = vcmp.eq.s32.totalorder %v302_v11, %v3239_v56  ;;  %v2989_v11 = vld [vmem:[#allocation2 + $0x128] sm:$0xff]  }
  0xfb   :  { %v3859_v7 = vsel %vm3433_vm4, 4294967295, %v3858_v7  ;;  %2426 = vmatmul.mubr.msk.bf16.gmra.mrb[16].mxu1 %vm3433_vm4, %v3049_v60 }
  0xfd   :  { %v114_v9 = vpop.permute.xlu1 %113 }
  0xfe   :  { %vm174_vm8 = vcmp.eq.s32.totalorder %v114_v9, %v3239_v56  ;;  %v2986_v9 = vld [vmem:[#allocation2 + $0x90] sm:$0xff]  }
  0xff   :  { %vm3443_vm6 = vmpackc.low %vm174_vm8, %vm173_vm7 }
 0x100   :  { %v3861_v10 = vsel %vm3443_vm6, 4294967295, %v3860_v10  ;;  %2569 = vmatprep.mubr.msk.bf16.mxu0 %vm3443_vm6, %v3049_v60 }
 0x102   :  { %v299_v12 = vpop.permute.xlu1 %298 }
 0x103   :  { %vm353_vm0 = vcmp.eq.s32.totalorder %v299_v12, %v3239_v56  ;;  %v2988_v12 = vld [vmem:[#allocation2 + $0x98] sm:$0xff]  }
 0x104   :  { %vm3452_vm4 = vmpackc.low %vm354_vm3, %vm353_vm0  ;;  %vm355_vm3 = vcmp.eq.s32.totalorder %v305_v19, %v3239_v56  ;;  %v2992_v19 = vld [vmem:[#allocation2 + $0xa8] sm:$0xff]  }
 0x105   :  { %v3863_v13 = vsel %vm3452_vm4, 4294967295, %v3862_v13  ;;  %2429 = vmatprep.mubr.msk.bf16.mxu1 %vm3452_vm4, %v3049_v60 }
 0x107   :  { %v117_v63 = vpop.permute.xlu1 %116 }
 0x108   :  { %vm175_vm7 = vcmp.eq.s32.totalorder %v117_v63, %v3239_v56  ;;  %v2990_v63 = vld [vmem:[#allocation2 + $0xa0] sm:$0xff]  }
 0x10b   :  { %v120_v14 = vpop.permute.xlu1 %119 }
 0x10c   :  { %vm176_vm8 = vcmp.eq.s32.totalorder %v120_v14, %v3239_v56  ;;  %v2993_v14 = vld [vmem:[#allocation2 + $0x138] sm:$0xff]  }
 0x10d   :  { %vm3461_vm6 = vmpackc.low %vm176_vm8, %vm175_vm7  ;;  %vm177_vm7 = vcmp.eq.s32.totalorder %v3263_v4, %v3239_v56 }
 0x10e   :  { %v3865_v18 = vsel %vm3461_vm6, 4294967295, %v3864_v18  ;;  %2570 = vmatmul.mubr.msk.bf16.gmra.mrb[16].mxu0 %vm3461_vm6, %v3049_v60 }
 0x110   :  { %v308_v20 = vpop.permute.xlu1 %307 }
 0x111   :  { %vm356_vm0 = vcmp.eq.s32.totalorder %v308_v20, %v3239_v56  ;;  %v2994_v20 = vld [vmem:[#allocation2 + $0xb0] sm:$0xff]  }
 0x112   :  { %vm3470_vm4 = vmpackc.low %vm356_vm0, %vm355_vm3  ;;  %vm358_vm3 = vcmp.eq.s32.totalorder %v314_v25, %v3239_v56 }
 0x113   :  { %v3867_v21 = vsel %vm3470_vm4, 4294967295, %v3866_v21  ;;  %2430 = vmatmul.mubr.msk.bf16.gmra.mrb[20].mxu1 %vm3470_vm4, %v3049_v60 }
 0x115   :  { %v126_v23 = vpop.permute.xlu1 %125 }
 0x116   :  { %vm178_vm8 = vcmp.eq.s32.totalorder %v126_v23, %v3239_v56  ;;  %v2995_v23 = vld [vmem:[#allocation2 + $0xb8] sm:$0xff]  }
 0x117   :  { %vm3480_vm6 = vmpackc.low %vm178_vm8, %vm177_vm7 }
 0x118   :  { %v3869_v24 = vsel %vm3480_vm6, 4294967295, %v3868_v24  ;;  %2573 = vmatprep.mubr.msk.bf16.mxu0 %vm3480_vm6, %v3049_v60 }
 0x11a   :  { %v311_v27 = vpop.permute.xlu1 %310 }
 0x11b   :  { %vm357_vm0 = vcmp.eq.s32.totalorder %v311_v27, %v3239_v56 }
 0x11c   :  { %vm3489_vm4 = vmpackc.low %vm358_vm3, %vm357_vm0  ;;  %vm359_vm3 = vcmp.eq.s32.totalorder %v317_v0, %v3239_v56 }
 0x11d   :  { %v3871_v28 = vsel %vm3489_vm4, 4294967295, %v3870_v28  ;;  %2433 = vmatprep.mubr.msk.bf16.mxu1 %vm3489_vm4, %v3049_v60 }
 0x11f   :  { %v129_v4 = vpop.permute.xlu1 %128 }
 0x120   :  { %vm179_vm7 = vcmp.eq.s32.totalorder %v129_v4, %v3239_v56 }
 0x123   :  { %v132_v29 = vpop.permute.xlu1 %131 }
 0x124   :  { %vm180_vm8 = vcmp.eq.s32.totalorder %v132_v29, %v3239_v56 }
 0x125   :  { %vm3498_vm6 = vmpackc.low %vm180_vm8, %vm179_vm7  ;;  %vm181_vm7 = vcmp.eq.s32.totalorder %v3267_v6, %v3239_v56 }
 0x126   :  { %v3873_v31 = vsel %vm3498_vm6, 4294967295, %v3872_v31  ;;  %2574 = vmatmul.mubr.msk.bf16.gmra.mrb[20].mxu0 %vm3498_vm6, %v3049_v60 }
 0x128   :  { %v320_v32 = vpop.permute.xlu1 %319 }
 0x129   :  { %vm360_vm0 = vcmp.eq.s32.totalorder %v320_v32, %v3239_v56 }
 0x12a   :  { %vm3507_vm4 = vmpackc.low %vm360_vm0, %vm359_vm3  ;;  %vm362_vm3 = vcmp.eq.s32.totalorder %v326_v1, %v3239_v56 }
 0x12b   :  { %v3875_v34 = vsel %vm3507_vm4, 4294967295, %v3874_v34  ;;  %2434 = vmatmul.mubr.msk.bf16.gmra.mrb[24].mxu1 %vm3507_vm4, %v3049_v60 }
 0x12d   :  { %v138_v35 = vpop.permute.xlu1 %137 }
 0x12e   :  { %vm182_vm8 = vcmp.eq.s32.totalorder %v138_v35, %v3239_v56 }
 0x12f   :  { %vm3517_vm6 = vmpackc.low %vm182_vm8, %vm181_vm7 }
 0x130   :  { %v3877_v36 = vsel %vm3517_vm6, 4294967295, %v3876_v36  ;;  %2577 = vmatprep.mubr.msk.bf16.mxu0 %vm3517_vm6, %v3049_v60 }
 0x132   :  { %v323_v38 = vpop.permute.xlu1 %322 }
 0x133   :  { %vm361_vm0 = vcmp.eq.s32.totalorder %v323_v38, %v3239_v56 }
 0x134   :  { %vm3526_vm4 = vmpackc.low %vm362_vm3, %vm361_vm0  ;;  %vm363_vm3 = vcmp.eq.s32.totalorder %v329_v42, %v3239_v56 }
 0x135   :  { %v3879_v39 = vsel %vm3526_vm4, 4294967295, %v3878_v39  ;;  %2437 = vmatprep.mubr.msk.bf16.mxu1 %vm3526_vm4, %v3049_v60 }
 0x137   :  { %v141_v6 = vpop.permute.xlu1 %140 }
 0x138   :  { %vm183_vm7 = vcmp.eq.s32.totalorder %v141_v6, %v3239_v56 }
 0x13b   :  { %v144_v40 = vpop.permute.xlu1 %143 }
 0x13c   :  { %vm184_vm8 = vcmp.eq.s32.totalorder %v144_v40, %v3239_v56 }
 0x13d   :  { %vm3535_vm6 = vmpackc.low %vm184_vm8, %vm183_vm7  ;;  %vm185_vm7 = vcmp.eq.s32.totalorder %v147_v48, %v3239_v56 }
 0x13e   :  { %v3881_v43 = vsel %vm3535_vm6, 4294967295, %v3880_v43  ;;  %2578 = vmatmul.mubr.msk.bf16.gmra.mrb[24].mxu0 %vm3535_vm6, %v3049_v60 }
 0x140   :  { %v332_v47 = vpop.permute.xlu1 %331 }
 0x141   :  { %vm364_vm0 = vcmp.eq.s32.totalorder %v332_v47, %v3239_v56 }
 0x142   :  { %vm3544_vm4 = vmpackc.low %vm364_vm0, %vm363_vm3  ;;  %vm188_vm3 = vcmp.eq.s32.totalorder %v156_v55, %v3239_v56 }
 0x143   :  { %v3883_v49 = vsel %vm3544_vm4, 4294967295, %v3882_v49  ;;  %2438 = vmatmul.mubr.msk.bf16.gmra.mrb[28].mxu1 %vm3544_vm4, %v3049_v60 }
 0x144   :  { %2457 = vmatprep.mubr.msk.bf16.mxu1 %vm3247_vm2, %v3049_v60 }
 0x145   :  { %v150_v51 = vpop.permute.xlu1 %149 }
 0x146   :  { %vm186_vm8 = vcmp.eq.s32.totalorder %v150_v51, %v3239_v56 }
 0x147   :  { %vm3556_vm6 = vmpackc.low %vm186_vm8, %vm185_vm7  ;;  %vm3888_vm7 = vnez %v3837_v26  ;;  %vm3889_vm8 = vnez %v3839_v30 }
 0x148   :  { %v3885_v53 = vsel %vm3556_vm6, 4294967295, %v3884_v53  ;;  %2581 = vmatprep.mubr.msk.bf16.mxu0 %vm3556_vm6, %v3049_v60 }
 0x149   :  { %v153_v57 = vpop.permute.xlu1 %152 }
 0x14a   :  { %vm187_vm0 = vcmp.eq.s32.totalorder %v153_v57, %v3239_v56  ;;  %v2983_v56 = vld [vmem:[#allocation2 + $0x110] sm:$0xff]  }
 0x14b   :  { %vm3565_vm4 = vmpackc.low %vm188_vm3, %vm187_vm0  ;;  %2458 = vmatmul.mubr.msk.bf16.vlgmr.msra.gmra.mrb[0].mxu1 %vm3269_vm5, %v3049_v60  ;;  %vm3890_vm3 = vnez %v3857_v2  ;;  %vm3891_vm0 = vnez %v3861_v10 }
 0x14c   :  { %v3887_v62 = vsel %vm3565_vm4, 4294967295, %v3886_v62  ;;  %2461 = vmatprep.mubr.msk.bf16.mxu1 %vm3285_vm11, %v3049_v60  ;;  %2490 = vmatpush3.bf16.msra.mxu1 %v3381_v46  ;;  %v2987_v46 = vld [vmem:[#allocation2 + $0x120] sm:$0xff]  }
 0x14d   :  { %2582 = vmatmul.mubr.msk.bf16.gmra.mrb[28].mxu0 %vm3565_vm4, %v3049_v60  ;;  %2491 = vmatprep.subr.bf16.mxu1 %v2981_v61 }
 0x14e   :  { %2601 = vmatprep.mubr.msk.bf16.mxu0 %vm3291_vm13, %v3049_v60 }
 0x150   :  { %2492 = vmatpush3.bf16.msra.mxu1 %v2981_v61 }
 0x151   :  { %2493 = vmatprep.subr.bf16.mxu1 %v2983_v56 }
 0x153   :  { %2462 = vmatmul.mubr.msk.bf16.gmra.mrb[4].mxu1 %vm3341_vm15, %v3049_v60  ;;  %vm3897_vm15 = vnez %v3855_v58 }
 0x154   :  { %2465 = vmatprep.mubr.msk.bf16.mxu1 %vm3363_vm10, %v3049_v60  ;;  %2494 = vmatpush3.bf16.msra.mxu1 %v2983_v56  ;;  %vm3896_vm10 = vnez %v3851_v52 }
 0x155   :  { %2602 = vmatmul.mubr.msk.bf16.vlgmr.msra.gmra.mrb[0].mxu0 %vm3299_vm14, %v3049_v60  ;;  %2495 = vmatprep.subr.bf16.mxu1 %v2985_v3 }
 0x156   :  { %2634 = vmatpush3.bf16.msra.mxu0 %v3372_v44  ;;  %2605 = vmatprep.mubr.msk.bf16.mxu0 %vm3311_vm1, %v3049_v60  ;;  %v2991_v44 = vld [vmem:[#allocation2 + $0x130] sm:$0xff]  }
 0x157   :  { %2635 = vmatprep.subr.bf16.mxu0 %v2984_v5 }
 0x158   :  { %2496 = vmatpush3.bf16.msra.mxu1 %v2985_v3 }
 0x159   :  { %2497 = vmatprep.subr.bf16.mxu1 %v2987_v46 }
 0x15a   :  { %2636 = vmatpush3.bf16.msra.mxu0 %v2984_v5 }
 0x15b   :  { %2466 = vmatmul.mubr.msk.bf16.gmra.mrb[8].mxu1 %vm3387_vm12, %v3049_v60  ;;  %2637 = vmatprep.subr.bf16.mxu0 %v2986_v9  ;;  %vm3893_vm12 = vnez %v3847_v45 }
 0x15c   :  { %2469 = vmatprep.mubr.msk.bf16.mxu1 %vm3406_vm9, %v3049_v60  ;;  %2498 = vmatpush3.bf16.msra.mxu1 %v2987_v46  ;;  %vm3892_vm9 = vnez %v3843_v37 }
 0x15d   :  { %2606 = vmatmul.mubr.msk.bf16.gmra.mrb[4].mxu0 %vm3888_vm7, %v3049_v60  ;;  %2499 = vmatprep.subr.bf16.mxu1 %v2989_v11 }
 0x15e   :  { %2609 = vmatprep.mubr.msk.bf16.mxu0 %vm3889_vm8, %v3049_v60  ;;  %2638 = vmatpush3.bf16.msra.mxu0 %v2986_v9 }
 0x15f   :  { %2639 = vmatprep.subr.bf16.mxu0 %v2988_v12 }
 0x160   :  { %2500 = vmatpush3.bf16.msra.mxu1 %v2989_v11 }
 0x161   :  { %2501 = vmatprep.subr.bf16.mxu1 %v2991_v44 }
 0x162   :  { %2640 = vmatpush3.bf16.msra.mxu0 %v2988_v12 }
 0x163   :  { %2470 = vmatmul.mubr.msk.bf16.gmra.mrb[12].mxu1 %vm3890_vm3, %v3049_v60  ;;  %2641 = vmatprep.subr.bf16.mxu0 %v2990_v63  ;;  %vm3894_vm3 = vnez %v3865_v18 }
 0x164   :  { %2473 = vmatprep.mubr.msk.bf16.mxu1 %vm3891_vm0, %v3049_v60  ;;  %2502 = vmatpush3.bf16.msra.mxu1 %v2991_v44  ;;  %vm3895_vm0 = vnez %v3869_v24 }
 0x165   :  { %2610 = vmatmul.mubr.msk.bf16.gmra.mrb[8].mxu0 %vm3892_vm9, %v3049_v60  ;;  %2503 = vmatprep.subr.bf16.mxu1 %v2993_v14 }
 0x166   :  { %2613 = vmatprep.mubr.msk.bf16.mxu0 %vm3893_vm12, %v3049_v60  ;;  %2642 = vmatpush3.bf16.msra.mxu0 %v2990_v63  ;;  %vm3899_vm12 = vnez %v3877_v36 }
 0x167   :  { %2643 = vmatprep.subr.bf16.mxu0 %v2992_v19 }
 0x168   :  { %2504 = vmatpush3.bf16.msra.mxu1 %v2993_v14 }
 0x16a   :  { %2644 = vmatpush3.bf16.msra.mxu0 %v2992_v19 }
 0x16b   :  { %2474 = vmatmul.mubr.msk.bf16.gmra.mrb[16].mxu1 %vm3894_vm3, %v3049_v60  ;;  %2645 = vmatprep.subr.bf16.mxu0 %v2994_v20  ;;  %vm3898_vm3 = vnez %v3873_v31 }
 0x16c   :  { %2477 = vmatprep.mubr.msk.bf16.mxu1 %vm3895_vm0, %v3049_v60  ;;  %vm3900_vm0 = vnez %v3859_v7 }
 0x16d   :  { %2614 = vmatmul.mubr.msk.bf16.gmra.mrb[12].mxu0 %vm3896_vm10, %v3049_v60  ;;  %vm3901_vm10 = vnez %v3863_v13 }
 0x16e   :  { %2617 = vmatprep.mubr.msk.bf16.mxu0 %vm3897_vm15, %v3049_v60  ;;  %2646 = vmatpush3.bf16.msra.mxu0 %v2994_v20  ;;  %vm3902_vm15 = vnez %v3881_v43 }
 0x16f   :  { %2647 = vmatprep.subr.bf16.mxu0 %v2995_v23 }
 0x172   :  { %2648 = vmatpush3.bf16.msra.mxu0 %v2995_v23 }
 0x173   :  { %2478 = vmatmul.mubr.msk.bf16.gmra.mrb[20].mxu1 %vm3898_vm3, %v3049_v60  ;;  %vm3903_vm3 = vnez %v3867_v21 }
 0x174   :  { %2481 = vmatprep.mubr.msk.bf16.mxu1 %vm3899_vm12, %v3049_v60  ;;  %vm3904_vm12 = vnez %v3871_v28 }
 0x175   :  { %2618 = vmatmul.mubr.msk.bf16.gmra.mrb[16].mxu0 %vm3900_vm0, %v3049_v60 }
 0x176   :  { %2621 = vmatprep.mubr.msk.bf16.mxu0 %vm3901_vm10, %v3049_v60 }
 0x17b   :  { %2482 = vmatmul.mubr.msk.bf16.gmra.mrb[24].mxu1 %vm3902_vm15, %v3049_v60  ;;  %vm3905_vm15 = vnez %v3875_v34 }
 0x17c   :  { %2485 = vmatprep.mubr.msk.bf16.mxu1 %vm3556_vm6, %v3049_v60  ;;  %vm3906_vm6 = vnez %v3879_v39 }
 0x17d   :  { %2622 = vmatmul.mubr.msk.bf16.gmra.mrb[20].mxu0 %vm3903_vm3, %v3049_v60 }
 0x17e   :  { %2625 = vmatprep.mubr.msk.bf16.mxu0 %vm3904_vm12, %v3049_v60 }
 0x183   :  { %2486 = vmatmul.mubr.msk.bf16.gmra.mrb[28].mxu1 %vm3565_vm4, %v3049_v60  ;;  %vm3907_vm4 = vnez %v3883_v49 }
 0x184   :  { %2505 = vmatprep.mubr.msk.bf16.mxu1 %vm3291_vm13, %v3049_v60  ;;  %vm3909_vm13 = vnez %v3841_v33 }
 0x185   :  { %2626 = vmatmul.mubr.msk.bf16.gmra.mrb[24].mxu0 %vm3905_vm15, %v3049_v60 }
 0x186   :  { %2629 = vmatprep.mubr.msk.bf16.mxu0 %vm3906_vm6, %v3049_v60 }
 0x18b   :  { %2506 = vmatmul.mubr.msk.bf16.vlgmr.msra.gmra.mrb[0].mxu1 %vm3299_vm14, %v3049_v60  ;;  %vm3910_vm14 = vnez %v3845_v41 }
 0x18c   :  { %2509 = vmatprep.mubr.msk.bf16.mxu1 %vm3311_vm1, %v3049_v60  ;;  %vm3913_vm1 = vnez %v3849_v50 }
 0x18d   :  { %2630 = vmatmul.mubr.msk.bf16.gmra.mrb[28].mxu0 %vm3907_vm4, %v3049_v60 }
 0x18e   :  { %2649 = vmatprep.mubr.msk.bf16.mxu0 %vm3247_vm2, %v3049_v60  ;;  %vm3908_vm2 = vnez %v3847_v45 }
 0x193   :  { %2510 = vmatmul.mubr.msk.bf16.gmra.mrb[4].mxu1 %vm3888_vm7, %v3049_v60  ;;  %vm3915_vm7 = vnez %v3857_v2 }
 0x194   :  { %2513 = vmatprep.mubr.msk.bf16.mxu1 %vm3889_vm8, %v3049_v60  ;;  %vm3916_vm8 = vnez %v3861_v10 }
 0x195   :  { %2650 = vmatmul.mubr.msk.bf16.vlgmr.msra.gmra.mrb[0].mxu0 %vm3269_vm5, %v3049_v60  ;;  %vm3911_vm5 = vnez %v3851_v52 }
 0x196   :  { %2653 = vmatprep.mubr.msk.bf16.mxu0 %vm3285_vm11, %v3049_v60  ;;  %vm3912_vm11 = vnez %v3855_v58 }
 0x19b   :  { %2514 = vmatmul.mubr.msk.bf16.gmra.mrb[8].mxu1 %vm3892_vm9, %v3049_v60  ;;  %vm3914_vm9 = vnez %v3853_v54 }
 0x19c   :  { %2517 = vmatprep.mubr.msk.bf16.mxu1 %vm3908_vm2, %v3049_v60  ;;  %vm3921_vm2 = vnez %v3881_v43 }
 0x19d   :  { %2654 = vmatmul.mubr.msk.bf16.gmra.mrb[4].mxu0 %vm3909_vm13, %v3049_v60 }
 0x19e   :  { %2657 = vmatprep.mubr.msk.bf16.mxu0 %vm3910_vm14, %v3049_v60 }
 0x1a3   :  { %2518 = vmatmul.mubr.msk.bf16.gmra.mrb[12].mxu1 %vm3911_vm5, %v3049_v60 }
 0x1a4   :  { %2521 = vmatprep.mubr.msk.bf16.mxu1 %vm3912_vm11, %v3049_v60 }
 0x1a5   :  { %2658 = vmatmul.mubr.msk.bf16.gmra.mrb[8].mxu0 %vm3913_vm1, %v3049_v60 }
 0x1a6   :  { %2661 = vmatprep.mubr.msk.bf16.mxu0 %vm3914_vm9, %v3049_v60 }
 0x1ab   :  { %2522 = vmatmul.mubr.msk.bf16.gmra.mrb[16].mxu1 %vm3900_vm0, %v3049_v60  ;;  %vm3917_vm0 = vnez %v3865_v18 }
 0x1ac   :  { %2525 = vmatprep.mubr.msk.bf16.mxu1 %vm3901_vm10, %v3049_v60  ;;  %vm3918_vm10 = vnez %v3869_v24 }
 0x1ad   :  { %2662 = vmatmul.mubr.msk.bf16.gmra.mrb[12].mxu0 %vm3915_vm7, %v3049_v60 }
 0x1ae   :  { %2665 = vmatprep.mubr.msk.bf16.mxu0 %vm3916_vm8, %v3049_v60 }
 0x1b3   :  { %2526 = vmatmul.mubr.msk.bf16.gmra.mrb[20].mxu1 %vm3903_vm3, %v3049_v60  ;;  %vm3919_vm3 = vnez %v3873_v31 }
 0x1b4   :  { %2529 = vmatprep.mubr.msk.bf16.mxu1 %vm3904_vm12, %v3049_v60  ;;  %vm3920_vm12 = vnez %v3877_v36 }
 0x1b5   :  { %2666 = vmatmul.mubr.msk.bf16.gmra.mrb[16].mxu0 %vm3917_vm0, %v3049_v60 }
 0x1b6   :  { %2669 = vmatprep.mubr.msk.bf16.mxu0 %vm3918_vm10, %v3049_v60 }
 0x1bb   :  { %2530 = vmatmul.mubr.msk.bf16.gmra.mrb[24].mxu1 %vm3905_vm15, %v3049_v60  ;;  %vm3922_vm15 = vnez %v3885_v53 }
 0x1bc   :  { %2533 = vmatprep.mubr.msk.bf16.mxu1 %vm3906_vm6, %v3049_v60  ;;  %vm3923_vm6 = vnez %v3887_v62 }
 0x1bd   :  { %2670 = vmatmul.mubr.msk.bf16.gmra.mrb[20].mxu0 %vm3919_vm3, %v3049_v60 }
 0x1be   :  { %2673 = vmatprep.mubr.msk.bf16.mxu0 %vm3920_vm12, %v3049_v60 }
 0x1c3   :  { %2534 = vmatmul.mubr.msk.bf16.gmra.mrb[28].mxu1 %vm3907_vm4, %v3049_v60 }
 0x1c5   :  { %2674 = vmatmul.mubr.msk.bf16.gmra.mrb[24].mxu0 %vm3921_vm2, %v3049_v60 }
 0x1c6   :  { %2677 = vmatprep.mubr.msk.bf16.mxu0 %vm3922_vm15, %v3049_v60 }
 0x1cd   :  { %2678 = vmatmul.mubr.msk.bf16.gmra.mrb[28].mxu0 %vm3923_vm6, %v3049_v60 }
 0x25e   :  { %v2507_v59 = vpop.f32.mrb[0].mxu1 }
 0x25f   :  { %v1044_v8 = vpop.f32.mrb[1].mxu1 }
 0x260   :  { %v2508_v15 = vpop.f32.mrb[2].mxu1 }
 0x261   :  { %v1047_v16 = vpop.f32.mrb[3].mxu1 }
 0x266   :  { %v2511_v17 = vpop.f32.mrb[4].mxu1 }
 0x267   :  { %v1060_v22 = vpop.f32.mrb[5].mxu1 }
 0x268   :  { %v2651_v26 = vpop.f32.mrb[0].mxu0  ;;  %v2512_v30 = vpop.f32.mrb[6].mxu1 }
 0x269   :  { %v2683_v33 = vadd.f32 %v2651_v26, %v2507_v59  ;;  %v1801_v37 = vpop.f32.mrb[1].mxu0  ;;  %v1063_v41 = vpop.f32.mrb[7].mxu1 }
 0x26a   :  { %v2686_v45 = vadd.f32 %v1801_v37, %v1044_v8  ;;  %v2652_v50 = vpop.f32.mrb[2].mxu0 }
 0x26b   :  { %1962 = vst [vmem:[#allocation5 + $0x10] sm:$0xff] %v2683_v33  ;;  %v2689_v52 = vadd.f32 %v2652_v50, %v2508_v15  ;;  %v1804_v54 = vpop.f32.mrb[3].mxu0 }
 0x26c   :  { %1960 = vst [vmem:[#allocation5] sm:$0xff] %v2686_v45  ;;  %v2692_v58 = vadd.f32 %v1804_v54, %v1047_v16 }
 0x26d   :  { %1963 = vst [vmem:[#allocation5 + $0x18] sm:$0xff] %v2689_v52 }
 0x26e   :  { %1961 = vst [vmem:[#allocation5 + $0x8] sm:$0xff] %v2692_v58  ;;  %v2515_v60 = vpop.f32.mrb[8].mxu1 }
 0x26f   :  { %v1076_v2 = vpop.f32.mrb[9].mxu1 }
 0x270   :  { %v2655_v7 = vpop.f32.mrb[4].mxu0  ;;  %v2516_v10 = vpop.f32.mrb[10].mxu1 }
 0x271   :  { %v2695_v13 = vadd.f32 %v2655_v7, %v2511_v17  ;;  %v1817_v18 = vpop.f32.mrb[5].mxu0  ;;  %v1079_v21 = vpop.f32.mrb[11].mxu1 }
 0x272   :  { %v2698_v24 = vadd.f32 %v1817_v18, %v1060_v22  ;;  %v2656_v25 = vpop.f32.mrb[6].mxu0 }
 0x273   :  { %1966 = vst [vmem:[#allocation5 + $0x30] sm:$0xff] %v2695_v13  ;;  %v2701_v27 = vadd.f32 %v2656_v25, %v2512_v30  ;;  %v1820_v28 = vpop.f32.mrb[7].mxu0 }
 0x274   :  { %1964 = vst [vmem:[#allocation5 + $0x20] sm:$0xff] %v2698_v24  ;;  %v2704_v4 = vadd.f32 %v1820_v28, %v1063_v41 }
 0x275   :  { %1967 = vst [vmem:[#allocation5 + $0x38] sm:$0xff] %v2701_v27 }
 0x276   :  { %1965 = vst [vmem:[#allocation5 + $0x28] sm:$0xff] %v2704_v4  ;;  %v2519_v29 = vpop.f32.mrb[12].mxu1 }
 0x277   :  { %v1092_v31 = vpop.f32.mrb[13].mxu1 }
 0x278   :  { %v2659_v0 = vpop.f32.mrb[8].mxu0  ;;  %v2520_v32 = vpop.f32.mrb[14].mxu1 }
 0x279   :  { %v2707_v34 = vadd.f32 %v2659_v0, %v2515_v60  ;;  %v1833_v35 = vpop.f32.mrb[9].mxu0  ;;  %v1095_v36 = vpop.f32.mrb[15].mxu1 }
 0x27a   :  { %v2710_v1 = vadd.f32 %v1833_v35, %v1076_v2  ;;  %v2660_v38 = vpop.f32.mrb[10].mxu0 }
 0x27b   :  { %1970 = vst [vmem:[#allocation5 + $0x50] sm:$0xff] %v2707_v34  ;;  %v2713_v39 = vadd.f32 %v2660_v38, %v2516_v10  ;;  %v1836_v6 = vpop.f32.mrb[11].mxu0 }
 0x27c   :  { %1968 = vst [vmem:[#allocation5 + $0x40] sm:$0xff] %v2710_v1  ;;  %v2716_v40 = vadd.f32 %v1836_v6, %v1079_v21 }
 0x27d   :  { %1971 = vst [vmem:[#allocation5 + $0x58] sm:$0xff] %v2713_v39 }
 0x27e   :  { %1969 = vst [vmem:[#allocation5 + $0x48] sm:$0xff] %v2716_v40  ;;  %v2523_v42 = vpop.f32.mrb[16].mxu1 }
 0x27f   :  { %v1108_v43 = vpop.f32.mrb[17].mxu1 }
 0x280   :  { %v2663_v47 = vpop.f32.mrb[12].mxu0  ;;  %v2524_v48 = vpop.f32.mrb[18].mxu1 }
 0x281   :  { %v2719_v49 = vadd.f32 %v2663_v47, %v2519_v29  ;;  %v1849_v51 = vpop.f32.mrb[13].mxu0  ;;  %v1111_v53 = vpop.f32.mrb[19].mxu1 }
 0x282   :  { %v2722_v55 = vadd.f32 %v1849_v51, %v1092_v31  ;;  %v2664_v57 = vpop.f32.mrb[14].mxu0 }
 0x283   :  { %1974 = vst [vmem:[#allocation5 + $0x70] sm:$0xff] %v2719_v49  ;;  %v2725_v61 = vadd.f32 %v2664_v57, %v2520_v32  ;;  %v1852_v62 = vpop.f32.mrb[15].mxu0 }
 0x284   :  { %1972 = vst [vmem:[#allocation5 + $0x60] sm:$0xff] %v2722_v55  ;;  %v2728_v56 = vadd.f32 %v1852_v62, %v1095_v36 }
 0x285   :  { %1975 = vst [vmem:[#allocation5 + $0x78] sm:$0xff] %v2725_v61 }
 0x286   :  { %1973 = vst [vmem:[#allocation5 + $0x68] sm:$0xff] %v2728_v56  ;;  %v2527_v3 = vpop.f32.mrb[20].mxu1 }
 0x287   :  { %v1124_v5 = vpop.f32.mrb[21].mxu1 }
 0x288   :  { %v2667_v46 = vpop.f32.mrb[16].mxu0  ;;  %v2528_v9 = vpop.f32.mrb[22].mxu1 }
 0x289   :  { %v2731_v11 = vadd.f32 %v2667_v46, %v2523_v42  ;;  %v1865_v12 = vpop.f32.mrb[17].mxu0  ;;  %v1127_v44 = vpop.f32.mrb[23].mxu1 }
 0x28a   :  { %v2734_v63 = vadd.f32 %v1865_v12, %v1108_v43  ;;  %v2668_v14 = vpop.f32.mrb[18].mxu0 }
 0x28b   :  { %1978 = vst [vmem:[#allocation5 + $0x90] sm:$0xff] %v2731_v11  ;;  %v2737_v19 = vadd.f32 %v2668_v14, %v2524_v48  ;;  %v1868_v20 = vpop.f32.mrb[19].mxu0 }
 0x28c   :  { %1976 = vst [vmem:[#allocation5 + $0x80] sm:$0xff] %v2734_v63  ;;  %v2740_v23 = vadd.f32 %v1868_v20, %v1111_v53 }
 0x28d   :  { %1979 = vst [vmem:[#allocation5 + $0x98] sm:$0xff] %v2737_v19 }
 0x28e   :  { %1977 = vst [vmem:[#allocation5 + $0x88] sm:$0xff] %v2740_v23  ;;  %v2531_v59 = vpop.f32.mrb[24].mxu1 }
 0x28f   :  { %v1140_v8 = vpop.f32.mrb[25].mxu1 }
 0x290   :  { %v2671_v15 = vpop.f32.mrb[20].mxu0  ;;  %v2532_v16 = vpop.f32.mrb[26].mxu1 }
 0x291   :  { %v2743_v17 = vadd.f32 %v2671_v15, %v2527_v3  ;;  %v1881_v22 = vpop.f32.mrb[21].mxu0  ;;  %v1143_v26 = vpop.f32.mrb[27].mxu1 }
 0x292   :  { %v2746_v30 = vadd.f32 %v1881_v22, %v1124_v5  ;;  %v2672_v33 = vpop.f32.mrb[22].mxu0 }
 0x293   :  { %1982 = vst [vmem:[#allocation5 + $0xb0] sm:$0xff] %v2743_v17  ;;  %v2749_v37 = vadd.f32 %v2672_v33, %v2528_v9  ;;  %v1884_v41 = vpop.f32.mrb[23].mxu0 }
 0x294   :  { %1980 = vst [vmem:[#allocation5 + $0xa0] sm:$0xff] %v2746_v30  ;;  %v2752_v45 = vadd.f32 %v1884_v41, %v1127_v44 }
 0x295   :  { %1983 = vst [vmem:[#allocation5 + $0xb8] sm:$0xff] %v2749_v37 }
 0x296   :  { %1981 = vst [vmem:[#allocation5 + $0xa8] sm:$0xff] %v2752_v45  ;;  %v2535_v50 = vpop.f32.mrb[28].mxu1 }
 0x297   :  { %v1156_v52 = vpop.f32.mrb[29].mxu1 }
 0x298   :  { %v2675_v54 = vpop.f32.mrb[24].mxu0  ;;  %v2536_v58 = vpop.f32.mrb[30].mxu1 }
 0x299   :  { %v2755_v60 = vadd.f32 %v2675_v54, %v2531_v59  ;;  %v1897_v2 = vpop.f32.mrb[25].mxu0  ;;  %v1159_v7 = vpop.f32.mrb[31].mxu1 }
 0x29a   :  { %v2758_v10 = vadd.f32 %v1897_v2, %v1140_v8  ;;  %v2676_v13 = vpop.f32.mrb[26].mxu0 }
 0x29b   :  { %1986 = vst [vmem:[#allocation5 + $0xd0] sm:$0xff] %v2755_v60  ;;  %v2761_v18 = vadd.f32 %v2676_v13, %v2532_v16  ;;  %v1900_v21 = vpop.f32.mrb[27].mxu0 }
 0x29c   :  { %1984 = vst [vmem:[#allocation5 + $0xc0] sm:$0xff] %v2758_v10  ;;  %v2764_v24 = vadd.f32 %v1900_v21, %v1143_v26 }
 0x29d   :  { %1987 = vst [vmem:[#allocation5 + $0xd8] sm:$0xff] %v2761_v18 }
 0x29e   :  { %1985 = vst [vmem:[#allocation5 + $0xc8] sm:$0xff] %v2764_v24 }
 0x2a0   :  { %v2679_v25 = vpop.f32.mrb[28].mxu0 }
 0x2a1   :  { %v2767_v27 = vadd.f32 %v2679_v25, %v2535_v50  ;;  %v1913_v28 = vpop.f32.mrb[29].mxu0 }
 0x2a2   :  { %v2770_v4 = vadd.f32 %v1913_v28, %v1156_v52  ;;  %v2680_v29 = vpop.f32.mrb[30].mxu0 }
 0x2a3   :  { %1990 = vst [vmem:[#allocation5 + $0xf0] sm:$0xff] %v2767_v27  ;;  %v2773_v31 = vadd.f32 %v2680_v29, %v2536_v58  ;;  %v1916_v0 = vpop.f32.mrb[31].mxu0 }
 0x2a4   :  { %1988 = vst [vmem:[#allocation5 + $0xe0] sm:$0xff] %v2770_v4  ;;  %v2776_v32 = vadd.f32 %v1916_v0, %v1159_v7 }
 0x2a5   :  { %1991 = vst [vmem:[#allocation5 + $0xf8] sm:$0xff] %v2773_v31 }
 0x2a6   :  { %1989 = vst [vmem:[#allocation5 + $0xe8] sm:$0xff] %v2776_v32 }
 0x2a7   :  { %3029 = shalt.err (!%p3026_p12)
}
 0x2a8   :  { %s3030_s4 = scalar_lea.hbm %s3777_s2, 4096 }
 0x2a9   :  { %p3031_p13 = scmp.ne.s32.totalorder %s3777_s2, %s3030_s4  ;;  %p3034_p0 = scmp.lt.u32.totalorder %s3030_s4, %s3777_s2 }
 0x2ab   :  { %p3036_p1 = pnand %p3034_p0, %p3031_p13 }
 0x2ad   :  { %3039 = shalt.err (!%p3036_p1)
}
 0x2ae   :  { %s3051_s9 = smov 128   ;;  %s3052_s10 = smov 8  }
 0x2af   :  { %2003 = dma.vmem_to_hbm [thread:$0]  %s1998_s28, 4096, %s3777_s2, [#allocation4], %s3051_s9, %s3051_s9, %s3052_s10  }
 0x2b0   :  { %3042 = dma.done.wait [#allocation4], 4096  }
 0x2b1   :  { %3043 = vsyncadd [#allocation4], 4294963200 }
 0x2b2   :  { %2007 = vsyncpa [#allocation3], 1 }
 0x2b3   :  { %2008 = vsyncpa [#allocation4], 1 }

</bundles_post_ra>
